<compile_context>
chip_gen: v6e
topology: v6e:2x2x1
jax: 0.10.0
libtpu: 0.0.40
codegen_flags: <defaults>
</compile_context>

<pallas_src>
import functools

import numpy as np
import jax
import jax.numpy as jnp
from jax.experimental import pallas as pl
from jax.experimental.pallas import tpu as pltpu

BN_EPS = 1e-5
GIN_EPS = 0.0      # GINConv default (eps=0, train_eps=False)

_LANE = 128        # lane padding for feature dims
_NODE_PAD = 128    # node-dim padding (keeps adjacency tiles lane-dense on the MXU)


def _round_up(v, m):
    return (v + m - 1) // m * m


def _vmem_limit_bytes():
    """Per-generation VMEM limit: leave headroom for compiler scratch / live
    temporaries on v7x (64 MiB physical), use most of v5e/v6e's 128 MiB."""
    try:
        cap = int(pltpu.get_tpu_info().vmem_capacity_bytes)
    except Exception:  # no TPU info available -> conservative default
        cap = 128 * 1024 * 1024
    if cap <= 64 * 1024 * 1024:                       # v7x-class
        return int(cap * 0.60)
    return min(int(cap * 0.78), 100 * 1024 * 1024)    # v5e / v6e-class


def _bn_train(h, gamma, beta):
    """BatchNorm1d forward with batch statistics (PyTorch training mode), f32."""
    mean = jnp.mean(h, axis=0, keepdims=True)
    var = jnp.mean((h - mean) ** 2, axis=0, keepdims=True)   # biased variance
    return (h - mean) * jax.lax.rsqrt(var + BN_EPS) * gamma + beta


def _bn_train_masked(h, gamma, beta, mask, inv_n):
    """Masked, single-pass BN: statistics over real (mask==1) rows only.
    One sweep builds sum(h*mask) and sum((h*mask)^2); var = E[x^2] - mean^2
    (f32 accumulation, clamped at 0 against cancellation)."""
    hm = h * mask                                   # mask is 0/1 -> hm^2 == h^2*mask
    s1 = jnp.sum(hm, axis=0, keepdims=True)
    s2 = jnp.sum(hm * hm, axis=0, keepdims=True)
    mean = s1 * inv_n
    var = jnp.maximum(s2 * inv_n - mean * mean, 0.0)
    return (h - mean) * (jax.lax.rsqrt(var + BN_EPS) * gamma) + beta


def _gin_kernel(x_ref, a_hbm_ref, w0_ref, b0_ref, g0_ref, be0_ref,
                w1s_ref, w2s_ref, gs_ref, bes_ref, out_ref,
                a_vmem, a_sem, *, nlayer, n_real, inv_n):
    # Kick off the largest DMA (A': HBM -> VMEM) immediately so it overlaps
    # with the transform stage below.
    a_copy = pltpu.make_async_copy(a_hbm_ref, a_vmem, a_sem)
    a_copy.start()

    # Node mask generated in-kernel (1 = real node, 0 = padded row).
    npad = x_ref.shape[0]
    mask = (jax.lax.broadcasted_iota(jnp.int32, (npad, 1), 0) < n_real
            ).astype(jnp.float32)

    # --- transform: Linear(nfeat, nhid) + BatchNorm1d(nhid) ---
    h = jnp.dot(x_ref[...], w0_ref[...],
                preferred_element_type=jnp.float32) + b0_ref[...]
    h = _bn_train_masked(h, g0_ref[...], be0_ref[...], mask, inv_n)

    # A' needed from here on.
    a_copy.wait()
    a = a_vmem[...]                                 # [Np, Np] bf16, A + (1+eps)*I

    # --- GIN layers (nlayer is static -> unrolled at trace time) ---
    for i in range(nlayer):
        # dropout(p=0) == identity
        # aggregation (self term folded into A'): agg = A' @ h
        agg = jnp.dot(a, h.astype(jnp.bfloat16), preferred_element_type=jnp.float32)
        # nn_i : Linear(nhid,nhid,bias=False) -> ReLU -> Linear(nhid,nhid,bias=False)
        t = jnp.dot(agg.astype(jnp.bfloat16), w1s_ref[i],
                    preferred_element_type=jnp.float32)
        t = jnp.maximum(t, 0.0)
        h = jnp.dot(t.astype(jnp.bfloat16), w2s_ref[i],
                    preferred_element_type=jnp.float32)
        # outer activation + BatchNorm1d
        h = jnp.maximum(h, 0.0)
        h = _bn_train_masked(h, gs_ref[i], bes_ref[i], mask, inv_n)

    out_ref[...] = h.astype(out_ref.dtype)          # lane-dense [Np, Hp] store


def gin_forward_pallas(x, adj, params, nlayer):
    N, nfeat = x.shape
    nhid = params["w0"].shape[1]

    Np = _round_up(N, _NODE_PAD)
    Fp = _round_up(nfeat, _LANE)
    Hp = _round_up(nhid, _LANE)

    f32, bf16 = jnp.float32, jnp.bfloat16

    # Zero-pad to lane/sublane multiples.  Padded weight columns are zero and
    # padded BN params are gamma=1/beta=0, so padded feature columns stay 0;
    # padded node rows are excluded from BN statistics via the in-kernel mask.
    x_p = jnp.zeros((Np, Fp), bf16).at[:N, :nfeat].set(x.astype(bf16))

    # A' = A + (1+eps)*I, built directly in bf16 (small-integer entries exact).
    diag = jnp.arange(N)
    a_p = (jnp.zeros((Np, Np), bf16)
           .at[:N, :N].set(adj.astype(bf16))
           .at[diag, diag].add(jnp.asarray(1.0 + GIN_EPS, bf16)))

    w0 = jnp.zeros((Fp, Hp), f32).at[:nfeat, :nhid].set(params["w0"]).astype(bf16)
    b0 = jnp.zeros((1, Hp), f32).at[:, :nhid].set(params["b0"])
    g0 = jnp.ones((1, Hp), f32).at[:, :nhid].set(params["g0"])
    be0 = jnp.zeros((1, Hp), f32).at[:, :nhid].set(params["be0"])
    w1s = jnp.zeros((nlayer, Hp, Hp), f32).at[:, :nhid, :nhid].set(params["w1s"]).astype(bf16)
    w2s = jnp.zeros((nlayer, Hp, Hp), f32).at[:, :nhid, :nhid].set(params["w2s"]).astype(bf16)
    gs = jnp.ones((nlayer, 1, Hp), f32).at[:, :, :nhid].set(params["gs"])
    bes = jnp.zeros((nlayer, 1, Hp), f32).at[:, :, :nhid].set(params["bes"])

    kernel = functools.partial(_gin_kernel, nlayer=nlayer, n_real=N, inv_n=1.0 / N)

    vmem_spec = pl.BlockSpec(memory_space=pltpu.MemorySpace.VMEM)   # single buffer
    hbm_spec = pl.BlockSpec(memory_space=pl.ANY)                    # manual DMA

    out = pl.pallas_call(
        kernel,
        out_shape=jax.ShapeDtypeStruct((Np, Hp), jnp.float32),
        in_specs=[
            vmem_spec,   # x (bf16)
            hbm_spec,    # A' (bf16) -- copied manually, overlapped with transform
            vmem_spec,   # w0 (bf16)
            vmem_spec,   # b0
            vmem_spec,   # gamma0
            vmem_spec,   # beta0
            vmem_spec,   # w1s (bf16)
            vmem_spec,   # w2s (bf16)
            vmem_spec,   # gammas
            vmem_spec,   # betas
        ],
        out_specs=vmem_spec,
        scratch_shapes=[
            pltpu.VMEM((Np, Np), bf16),     # A' landing buffer
            pltpu.SemaphoreType.DMA,        # its DMA semaphore
        ],
        compiler_params=pltpu.CompilerParams(
            vmem_limit_bytes=_vmem_limit_bytes()),
    )(x_p, a_p, w0, b0, g0, be0, w1s, w2s, gs, bes)

    return out[:N, :nhid]


def gin_forward_ref(x, adj, params, nlayer, matmul_dtype=jnp.float32):
    """Pure-JAX reference.  matmul_dtype=f32 -> PyTorch-equivalent f32 path;
    matmul_dtype=bf16 -> emulates the kernel's bf16-operand / f32-accumulate MXU."""
    def mm(a, b):
        return jnp.dot(a.astype(matmul_dtype), b.astype(matmul_dtype),
                       preferred_element_type=jnp.float32)

    n = adj.shape[0]
    a_prime = adj + (1.0 + GIN_EPS) * jnp.eye(n, dtype=adj.dtype)
    h = mm(x, params["w0"]) + params["b0"]
    h = _bn_train(h, params["g0"], params["be0"])
    for i in range(nlayer):
        agg = mm(a_prime, h)
        t = jnp.maximum(mm(agg, params["w1s"][i]), 0.0)
        h = mm(t, params["w2s"][i])
        h = jnp.maximum(h, 0.0)
        h = _bn_train(h, params["gs"][i], params["bes"][i])
    return h


def init_params(key, nfeat, nhid, nlayer):
    ks = jax.random.split(key, 4)
    return {
        # transform Linear(nfeat, nhid) stored as [in, out] so kernel does x @ W
        "w0": jax.random.normal(ks[0], (nfeat, nhid), jnp.float32) * 0.1,
        "b0": jax.random.normal(ks[1], (1, nhid), jnp.float32) * 0.1,
        # BatchNorm1d init: gamma=1, beta=0
        "g0": jnp.ones((1, nhid), jnp.float32),
        "be0": jnp.zeros((1, nhid), jnp.float32),
        # per-layer MLP weights (bias=False), stored [nlayer, in, out]
        "w1s": jax.random.normal(ks[2], (nlayer, nhid, nhid), jnp.float32) * 0.1,
        "w2s": jax.random.normal(ks[3], (nlayer, nhid, nhid), jnp.float32) * 0.1,
        "gs": jnp.ones((nlayer, 1, nhid), jnp.float32),
        "bes": jnp.zeros((nlayer, 1, nhid), jnp.float32),
    }


def build_edges_and_batch(num_graphs, nodes_per_graph):
    """Deterministic small graph batch: a directed ring (both directions) per graph."""
    src, dst, batch = [], [], []
    for g in range(num_graphs):
        off = g * nodes_per_graph
        for n in range(nodes_per_graph):
            batch.append(g)
            a = off + n
            b = off + (n + 1) % nodes_per_graph
            src += [a, b]
            dst += [b, a]
    edge_index = np.stack([np.array(src, np.int32), np.array(dst, np.int32)])
    return edge_index, np.array(batch, np.int32)


if __name__ == "__main__":
    nfeat, nhid, nlayer = 8, 32, 2
    num_graphs, nodes_per_graph = 2, 8
    N = num_graphs * nodes_per_graph

    key = jax.random.PRNGKey(0)
    kx, kp = jax.random.split(key)

    x = jax.random.normal(kx, (N, nfeat), jnp.float32)
    edge_index, batch = build_edges_and_batch(num_graphs, nodes_per_graph)

    # Dense adjacency: A[dst, src] = multiplicity of edge src -> dst
    adj = jnp.zeros((N, N), jnp.float32).at[edge_index[1], edge_index[0]].add(1.0)

    params = init_params(kp, nfeat, nhid, nlayer)

    out = gin_forward_pallas(x, adj, params, nlayer)
    out = jax.block_until_ready(out)
    assert out.shape == (N, nhid)

    # Tight check vs. a reference that emulates the kernel's bf16-operand /
    # f32-accumulate matmuls (verifies the kernel itself).
    ref_bf16 = gin_forward_ref(x, adj, params, nlayer, matmul_dtype=jnp.bfloat16)
    np.testing.assert_allclose(np.asarray(out), np.asarray(ref_bf16),
                               rtol=2e-3, atol=2e-3)

    # Loose check vs. the full-f32 PyTorch-equivalent path (bf16 matmul drift).
    ref_f32 = gin_forward_ref(x, adj, params, nlayer, matmul_dtype=jnp.float32)
    np.testing.assert_allclose(np.asarray(out), np.asarray(ref_f32),
                               rtol=2e-2, atol=1e-1)

    # emb_list: per-graph node embeddings (data.batch == g), host-side glue
    batch_np = np.asarray(batch)
    emb_list = [np.asarray(out)[batch_np == g] for g in range(num_graphs)]
    assert len(emb_list) == num_graphs
    assert all(e.shape == (nodes_per_graph, nhid) for e in emb_list)

    print("KERNEL_OK")
</pallas_src>

<mosaic_0001>
module attributes {stable_mosaic.version = 11 : i64} {
  func.func @_gin_kernel(%arg0: memref<128x128xbf16, #tpu.memory_space<vmem>>, %arg1: memref<128x128xbf16, #tpu.memory_space<any>>, %arg2: memref<128x128xbf16, #tpu.memory_space<vmem>>, %arg3: memref<1x128xf32, #tpu.memory_space<vmem>>, %arg4: memref<1x128xf32, #tpu.memory_space<vmem>>, %arg5: memref<1x128xf32, #tpu.memory_space<vmem>>, %arg6: memref<2x128x128xbf16, #tpu.memory_space<vmem>>, %arg7: memref<2x128x128xbf16, #tpu.memory_space<vmem>>, %arg8: memref<2x1x128xf32, #tpu.memory_space<vmem>>, %arg9: memref<2x1x128xf32, #tpu.memory_space<vmem>>, %arg10: memref<128x128xf32, #tpu.memory_space<vmem>>, %arg11: memref<128x128xbf16, #tpu.memory_space<vmem>>, %arg12: memref<!tpu.dma_semaphore, #tpu.memory_space<semaphore_mem>>) attributes {dimension_semantics = [], scalar_prefetch = 0 : i64, scratch_operands = 2 : i64, tpu.core_type = #tpu.core_type<tc>} {
    tpu.enqueue_dma source(%arg1 : memref<128x128xbf16, #tpu.memory_space<any>>) target(%arg11 : memref<128x128xbf16, #tpu.memory_space<vmem>>) target_semaphore(%arg12 : memref<!tpu.dma_semaphore, #tpu.memory_space<semaphore_mem>>)
    %0 = tpu.iota {dimensions = array<i32: 0>} : vector<128x1xi32>
    %c16_i32 = arith.constant 16 : i32
    %1 = vector.broadcast %c16_i32 : i32 to vector<128x1xi32>
    %2 = arith.cmpi slt, %0, %1 : vector<128x1xi32>
    %3 = arith.extui %2 : vector<128x1xi1> to vector<128x1xi32>
    %4 = arith.sitofp %3 : vector<128x1xi32> to vector<128x1xf32>
    %c0 = arith.constant 0 : index
    %c0_0 = arith.constant 0 : index
    %5 = vector.load %arg0[%c0, %c0_0] : memref<128x128xbf16, #tpu.memory_space<vmem>>, vector<128x128xbf16>
    %c0_1 = arith.constant 0 : index
    %c0_2 = arith.constant 0 : index
    %6 = vector.load %arg2[%c0_1, %c0_2] : memref<128x128xbf16, #tpu.memory_space<vmem>>, vector<128x128xbf16>
    %cst = arith.constant dense<0.000000e+00> : vector<128x128xf32>
    %7 = tpu.matmul %5, %6, %cst {dimension_numbers = #tpu.dot_dimension_numbers<[1], [0], [0], [1], [0, 0, 1, 1], [], []>} : vector<128x128xbf16>, vector<128x128xbf16>, vector<128x128xf32> -> vector<128x128xf32>
    %c0_3 = arith.constant 0 : index
    %c0_4 = arith.constant 0 : index
    %8 = vector.load %arg3[%c0_3, %c0_4] : memref<1x128xf32, #tpu.memory_space<vmem>>, vector<1x128xf32>
    %9 = vector.broadcast %8 : vector<1x128xf32> to vector<128x128xf32>
    %10 = arith.addf %7, %9 : vector<128x128xf32>
    %c0_5 = arith.constant 0 : index
    %c0_6 = arith.constant 0 : index
    %11 = vector.load %arg4[%c0_5, %c0_6] : memref<1x128xf32, #tpu.memory_space<vmem>>, vector<1x128xf32>
    %c0_7 = arith.constant 0 : index
    %c0_8 = arith.constant 0 : index
    %12 = vector.load %arg5[%c0_7, %c0_8] : memref<1x128xf32, #tpu.memory_space<vmem>>, vector<1x128xf32>
    %13 = vector.broadcast %4 : vector<128x1xf32> to vector<128x128xf32>
    %14 = arith.mulf %10, %13 : vector<128x128xf32>
    %cst_9 = arith.constant dense<0.000000e+00> : vector<128xf32>
    %15 = vector.multi_reduction <add>, %14, %cst_9 [0] : vector<128x128xf32> to vector<128xf32>
    %16 = vector.shape_cast %15 : vector<128xf32> to vector<1x128xf32>
    %17 = arith.mulf %14, %14 : vector<128x128xf32>
    %cst_10 = arith.constant dense<0.000000e+00> : vector<128xf32>
    %18 = vector.multi_reduction <add>, %17, %cst_10 [0] : vector<128x128xf32> to vector<128xf32>
    %19 = vector.shape_cast %18 : vector<128xf32> to vector<1x128xf32>
    %cst_11 = arith.constant 6.250000e-02 : f32
    %20 = vector.broadcast %cst_11 : f32 to vector<1x128xf32>
    %21 = arith.mulf %16, %20 : vector<1x128xf32>
    %cst_12 = arith.constant 6.250000e-02 : f32
    %22 = vector.broadcast %cst_12 : f32 to vector<1x128xf32>
    %23 = arith.mulf %19, %22 : vector<1x128xf32>
    %24 = arith.mulf %21, %21 : vector<1x128xf32>
    %25 = arith.subf %23, %24 : vector<1x128xf32>
    %cst_13 = arith.constant 0.000000e+00 : f32
    %26 = vector.broadcast %cst_13 : f32 to vector<1x128xf32>
    %27 = arith.maximumf %25, %26 : vector<1x128xf32>
    %28 = vector.broadcast %21 : vector<1x128xf32> to vector<128x128xf32>
    %29 = arith.subf %10, %28 : vector<128x128xf32>
    %cst_14 = arith.constant 9.99999974E-6 : f32
    %30 = vector.broadcast %cst_14 : f32 to vector<1x128xf32>
    %31 = arith.addf %27, %30 : vector<1x128xf32>
    %32 = math.rsqrt %31 : vector<1x128xf32>
    %33 = arith.mulf %32, %11 : vector<1x128xf32>
    %34 = vector.broadcast %33 : vector<1x128xf32> to vector<128x128xf32>
    %35 = arith.mulf %29, %34 : vector<128x128xf32>
    %36 = vector.broadcast %12 : vector<1x128xf32> to vector<128x128xf32>
    %37 = arith.addf %35, %36 : vector<128x128xf32>
    tpu.wait_dma2 semaphore(%arg12 : memref<!tpu.dma_semaphore, #tpu.memory_space<semaphore_mem>>) src(%arg1 : memref<128x128xbf16, #tpu.memory_space<any>>) dst(%arg11 : memref<128x128xbf16, #tpu.memory_space<vmem>>)
    %c0_15 = arith.constant 0 : index
    %c0_16 = arith.constant 0 : index
    %38 = vector.load %arg11[%c0_15, %c0_16] : memref<128x128xbf16, #tpu.memory_space<vmem>>, vector<128x128xbf16>
    %39 = arith.truncf %37 : vector<128x128xf32> to vector<128x128xbf16>
    %cst_17 = arith.constant dense<0.000000e+00> : vector<128x128xf32>
    %40 = tpu.matmul %38, %39, %cst_17 {dimension_numbers = #tpu.dot_dimension_numbers<[1], [0], [0], [1], [0, 0, 1, 1], [], []>} : vector<128x128xbf16>, vector<128x128xbf16>, vector<128x128xf32> -> vector<128x128xf32>
    %41 = arith.truncf %40 : vector<128x128xf32> to vector<128x128xbf16>
    %c0_18 = arith.constant 0 : index
    %c0_19 = arith.constant 0 : index
    %c0_20 = arith.constant 0 : index
    %42 = vector.load %arg6[%c0_18, %c0_19, %c0_20] : memref<2x128x128xbf16, #tpu.memory_space<vmem>>, vector<1x128x128xbf16>
    %43 = vector.shape_cast %42 : vector<1x128x128xbf16> to vector<128x128xbf16>
    %cst_21 = arith.constant dense<0.000000e+00> : vector<128x128xf32>
    %44 = tpu.matmul %41, %43, %cst_21 {dimension_numbers = #tpu.dot_dimension_numbers<[1], [0], [0], [1], [0, 0, 1, 1], [], []>} : vector<128x128xbf16>, vector<128x128xbf16>, vector<128x128xf32> -> vector<128x128xf32>
    %cst_22 = arith.constant 0.000000e+00 : f32
    %45 = vector.broadcast %cst_22 : f32 to vector<128x128xf32>
    %46 = arith.maximumf %44, %45 : vector<128x128xf32>
    %47 = arith.truncf %46 : vector<128x128xf32> to vector<128x128xbf16>
    %c0_23 = arith.constant 0 : index
    %c0_24 = arith.constant 0 : index
    %c0_25 = arith.constant 0 : index
    %48 = vector.load %arg7[%c0_23, %c0_24, %c0_25] : memref<2x128x128xbf16, #tpu.memory_space<vmem>>, vector<1x128x128xbf16>
    %49 = vector.shape_cast %48 : vector<1x128x128xbf16> to vector<128x128xbf16>
    %cst_26 = arith.constant dense<0.000000e+00> : vector<128x128xf32>
    %50 = tpu.matmul %47, %49, %cst_26 {dimension_numbers = #tpu.dot_dimension_numbers<[1], [0], [0], [1], [0, 0, 1, 1], [], []>} : vector<128x128xbf16>, vector<128x128xbf16>, vector<128x128xf32> -> vector<128x128xf32>
    %cst_27 = arith.constant 0.000000e+00 : f32
    %51 = vector.broadcast %cst_27 : f32 to vector<128x128xf32>
    %52 = arith.maximumf %50, %51 : vector<128x128xf32>
    %c0_28 = arith.constant 0 : index
    %c0_29 = arith.constant 0 : index
    %c0_30 = arith.constant 0 : index
    %53 = vector.load %arg8[%c0_28, %c0_29, %c0_30] : memref<2x1x128xf32, #tpu.memory_space<vmem>>, vector<1x1x128xf32>
    %54 = vector.shape_cast %53 : vector<1x1x128xf32> to vector<1x128xf32>
    %c0_31 = arith.constant 0 : index
    %c0_32 = arith.constant 0 : index
    %c0_33 = arith.constant 0 : index
    %55 = vector.load %arg9[%c0_31, %c0_32, %c0_33] : memref<2x1x128xf32, #tpu.memory_space<vmem>>, vector<1x1x128xf32>
    %56 = vector.shape_cast %55 : vector<1x1x128xf32> to vector<1x128xf32>
    %57 = vector.broadcast %4 : vector<128x1xf32> to vector<128x128xf32>
    %58 = arith.mulf %52, %57 : vector<128x128xf32>
    %cst_34 = arith.constant dense<0.000000e+00> : vector<128xf32>
    %59 = vector.multi_reduction <add>, %58, %cst_34 [0] : vector<128x128xf32> to vector<128xf32>
    %60 = vector.shape_cast %59 : vector<128xf32> to vector<1x128xf32>
    %61 = arith.mulf %58, %58 : vector<128x128xf32>
    %cst_35 = arith.constant dense<0.000000e+00> : vector<128xf32>
    %62 = vector.multi_reduction <add>, %61, %cst_35 [0] : vector<128x128xf32> to vector<128xf32>
    %63 = vector.shape_cast %62 : vector<128xf32> to vector<1x128xf32>
    %cst_36 = arith.constant 6.250000e-02 : f32
    %64 = vector.broadcast %cst_36 : f32 to vector<1x128xf32>
    %65 = arith.mulf %60, %64 : vector<1x128xf32>
    %cst_37 = arith.constant 6.250000e-02 : f32
    %66 = vector.broadcast %cst_37 : f32 to vector<1x128xf32>
    %67 = arith.mulf %63, %66 : vector<1x128xf32>
    %68 = arith.mulf %65, %65 : vector<1x128xf32>
    %69 = arith.subf %67, %68 : vector<1x128xf32>
    %cst_38 = arith.constant 0.000000e+00 : f32
    %70 = vector.broadcast %cst_38 : f32 to vector<1x128xf32>
    %71 = arith.maximumf %69, %70 : vector<1x128xf32>
    %72 = vector.broadcast %65 : vector<1x128xf32> to vector<128x128xf32>
    %73 = arith.subf %52, %72 : vector<128x128xf32>
    %cst_39 = arith.constant 9.99999974E-6 : f32
    %74 = vector.broadcast %cst_39 : f32 to vector<1x128xf32>
    %75 = arith.addf %71, %74 : vector<1x128xf32>
    %76 = math.rsqrt %75 : vector<1x128xf32>
    %77 = arith.mulf %76, %54 : vector<1x128xf32>
    %78 = vector.broadcast %77 : vector<1x128xf32> to vector<128x128xf32>
    %79 = arith.mulf %73, %78 : vector<128x128xf32>
    %80 = vector.broadcast %56 : vector<1x128xf32> to vector<128x128xf32>
    %81 = arith.addf %79, %80 : vector<128x128xf32>
    %82 = arith.truncf %81 : vector<128x128xf32> to vector<128x128xbf16>
    %cst_40 = arith.constant dense<0.000000e+00> : vector<128x128xf32>
    %83 = tpu.matmul %38, %82, %cst_40 {dimension_numbers = #tpu.dot_dimension_numbers<[1], [0], [0], [1], [0, 0, 1, 1], [], []>} : vector<128x128xbf16>, vector<128x128xbf16>, vector<128x128xf32> -> vector<128x128xf32>
    %84 = arith.truncf %83 : vector<128x128xf32> to vector<128x128xbf16>
    %c1 = arith.constant 1 : index
    %c0_41 = arith.constant 0 : index
    %c0_42 = arith.constant 0 : index
    %85 = vector.load %arg6[%c1, %c0_41, %c0_42] : memref<2x128x128xbf16, #tpu.memory_space<vmem>>, vector<1x128x128xbf16>
    %86 = vector.shape_cast %85 : vector<1x128x128xbf16> to vector<128x128xbf16>
    %cst_43 = arith.constant dense<0.000000e+00> : vector<128x128xf32>
    %87 = tpu.matmul %84, %86, %cst_43 {dimension_numbers = #tpu.dot_dimension_numbers<[1], [0], [0], [1], [0, 0, 1, 1], [], []>} : vector<128x128xbf16>, vector<128x128xbf16>, vector<128x128xf32> -> vector<128x128xf32>
    %cst_44 = arith.constant 0.000000e+00 : f32
    %88 = vector.broadcast %cst_44 : f32 to vector<128x128xf32>
    %89 = arith.maximumf %87, %88 : vector<128x128xf32>
    %90 = arith.truncf %89 : vector<128x128xf32> to vector<128x128xbf16>
    %c1_45 = arith.constant 1 : index
    %c0_46 = arith.constant 0 : index
    %c0_47 = arith.constant 0 : index
    %91 = vector.load %arg7[%c1_45, %c0_46, %c0_47] : memref<2x128x128xbf16, #tpu.memory_space<vmem>>, vector<1x128x128xbf16>
    %92 = vector.shape_cast %91 : vector<1x128x128xbf16> to vector<128x128xbf16>
    %cst_48 = arith.constant dense<0.000000e+00> : vector<128x128xf32>
    %93 = tpu.matmul %90, %92, %cst_48 {dimension_numbers = #tpu.dot_dimension_numbers<[1], [0], [0], [1], [0, 0, 1, 1], [], []>} : vector<128x128xbf16>, vector<128x128xbf16>, vector<128x128xf32> -> vector<128x128xf32>
    %cst_49 = arith.constant 0.000000e+00 : f32
    %94 = vector.broadcast %cst_49 : f32 to vector<128x128xf32>
    %95 = arith.maximumf %93, %94 : vector<128x128xf32>
    %c1_50 = arith.constant 1 : index
    %c0_51 = arith.constant 0 : index
    %c0_52 = arith.constant 0 : index
    %96 = vector.load %arg8[%c1_50, %c0_51, %c0_52] : memref<2x1x128xf32, #tpu.memory_space<vmem>>, vector<1x1x128xf32>
    %97 = vector.shape_cast %96 : vector<1x1x128xf32> to vector<1x128xf32>
    %c1_53 = arith.constant 1 : index
    %c0_54 = arith.constant 0 : index
    %c0_55 = arith.constant 0 : index
    %98 = vector.load %arg9[%c1_53, %c0_54, %c0_55] : memref<2x1x128xf32, #tpu.memory_space<vmem>>, vector<1x1x128xf32>
    %99 = vector.shape_cast %98 : vector<1x1x128xf32> to vector<1x128xf32>
    %100 = vector.broadcast %4 : vector<128x1xf32> to vector<128x128xf32>
    %101 = arith.mulf %95, %100 : vector<128x128xf32>
    %cst_56 = arith.constant dense<0.000000e+00> : vector<128xf32>
    %102 = vector.multi_reduction <add>, %101, %cst_56 [0] : vector<128x128xf32> to vector<128xf32>
    %103 = vector.shape_cast %102 : vector<128xf32> to vector<1x128xf32>
    %104 = arith.mulf %101, %101 : vector<128x128xf32>
    %cst_57 = arith.constant dense<0.000000e+00> : vector<128xf32>
    %105 = vector.multi_reduction <add>, %104, %cst_57 [0] : vector<128x128xf32> to vector<128xf32>
    %106 = vector.shape_cast %105 : vector<128xf32> to vector<1x128xf32>
    %cst_58 = arith.constant 6.250000e-02 : f32
    %107 = vector.broadcast %cst_58 : f32 to vector<1x128xf32>
    %108 = arith.mulf %103, %107 : vector<1x128xf32>
    %cst_59 = arith.constant 6.250000e-02 : f32
    %109 = vector.broadcast %cst_59 : f32 to vector<1x128xf32>
    %110 = arith.mulf %106, %109 : vector<1x128xf32>
    %111 = arith.mulf %108, %108 : vector<1x128xf32>
    %112 = arith.subf %110, %111 : vector<1x128xf32>
    %cst_60 = arith.constant 0.000000e+00 : f32
    %113 = vector.broadcast %cst_60 : f32 to vector<1x128xf32>
    %114 = arith.maximumf %112, %113 : vector<1x128xf32>
    %115 = vector.broadcast %108 : vector<1x128xf32> to vector<128x128xf32>
    %116 = arith.subf %95, %115 : vector<128x128xf32>
    %cst_61 = arith.constant 9.99999974E-6 : f32
    %117 = vector.broadcast %cst_61 : f32 to vector<1x128xf32>
    %118 = arith.addf %114, %117 : vector<1x128xf32>
    %119 = math.rsqrt %118 : vector<1x128xf32>
    %120 = arith.mulf %119, %97 : vector<1x128xf32>
    %121 = vector.broadcast %120 : vector<1x128xf32> to vector<128x128xf32>
    %122 = arith.mulf %116, %121 : vector<128x128xf32>
    %123 = vector.broadcast %99 : vector<1x128xf32> to vector<128x128xf32>
    %124 = arith.addf %122, %123 : vector<128x128xf32>
    %c0_62 = arith.constant 0 : index
    %c0_63 = arith.constant 0 : index
    %125 = vector.load %arg10[%c0_62, %c0_63] : memref<128x128xf32, #tpu.memory_space<vmem>>, vector<128x128xf32>
    tpu.vector_store %arg10[%c0_62, %c0_63], %124 {strides = array<i32>} : memref<128x128xf32, #tpu.memory_space<vmem>>, vector<128x128xf32>,
    return
  }
}

</mosaic_0001>

<bundles_post_ra>
// kernel: tpu_custom_call.1
= control target key start
LH: loop header
LB: loop body
LE: loop exit
PB: predicated region body
PF: predicated region fallthrough
CT: control target
= control target key end

     0   :  { %15 = vsyncpa [#allocation5], 0  ;;  %s2930_s0 = inlined_call_operand.hbm [shape: bf16[128,128], index: 0, kind: input, shape index: {}]   ;;  %s2931_s1 = inlined_call_operand.hbm [shape: bf16[128,128], index: 1, kind: input, shape index: {}]   ;;  %s2932_s2 = inlined_call_operand.hbm [shape: bf16[128,128], index: 2, kind: input, shape index: {}]   ;;  %s2933_s3 = inlined_call_operand.vmem [shape: f32[1,128], index: 3, kind: input, shape index: {}]   ;;  %s2934_s4 = inlined_call_operand.vmem [shape: f32[1,128], index: 4, kind: input, shape index: {}]   ;;  %s2935_s5 = inlined_call_operand.vmem [shape: f32[1,128], index: 5, kind: input, shape index: {}]   ;;  %s2936_s6 = inlined_call_operand.hbm [shape: bf16[2,128,128], index: 6, kind: input, shape index: {}]   ;;  %s2937_s7 = inlined_call_operand.hbm [shape: bf16[2,128,128], index: 7, kind: input, shape index: {}]   ;;  %s2938_s8 = inlined_call_operand.vmem [shape: f32[2,1,128], index: 8, kind: input, shape index: {}]   ;;  %s2939_s9 = inlined_call_operand.vmem [shape: f32[2,1,128], index: 9, kind: input, shape index: {}]   ;;  %s2940_s10 = inlined_call_operand.hbm [shape: f32[128,128], index: 10, kind: output, shape index: {}]  }
   0x1   :  { %16 = vsyncpa [#allocation8], 0 }
   0x2   :  { %17 = vsyncpa [#allocation11], 0 }
   0x3   :  { %18 = vsyncpa [#allocation6], 0  ;;  %s2504_s13 = smov [#allocation7]   ;;  %s2505_s15 = smov [#allocation4]  }
   0x4   :  { %s36_s14 = sshll.u32 %s2504_s13, 4  ;;  %s24_s16 = sshll.u32 %s2505_s15, 4  ;;  %s37_s14 = int_to_ptr.vmem [resolvable:$true] %s36_s14  ;;  %s25_s16 = int_to_ptr.vmem [resolvable:$true] %s24_s16 }
   0x5   :  { %s2382_s17 = scalar_lea.vmem %s37_s14, 1024  ;;  %p2387_p1 = scmp.lt.s32.totalorder %s37_s14, %s37_s14 }
   0x6   :  { %p2383_p0 = scmp.ne.s32.totalorder %s37_s14, %s2382_s17  ;;  %p2388_p2 = scmp.lt.s32.totalorder %s2382_s17, %s2382_s17 }
   0x8   :  { %p2389_p3 = por %p2388_p2, %p2387_p1 }
   0xa   :  { %p2390_p4 = pnand %p2389_p3, %p2383_p0 }
   0xc   :  { %2393 = shalt.err (!%p2390_p4)
}
   0xd   :  { %s2506_s18 = smov 64   ;;  %s2507_s19 = smov 4  }
   0xe   :  { %42 = dma.hbm_to_vmem [thread:$0]  %s2932_s2, 1024, %s37_s14, [#allocation8], %s2506_s18, %s2506_s18, %s2507_s19  }
   0xf   :  { %s2402_s22 = scalar_lea.vmem %s25_s16, 1024  ;;  %p2407_p6 = scmp.lt.s32.totalorder %s25_s16, %s25_s16 }
  0x10   :  { %p2403_p5 = scmp.ne.s32.totalorder %s25_s16, %s2402_s22  ;;  %p2408_p7 = scmp.lt.s32.totalorder %s2402_s22, %s2402_s22 }
  0x12   :  { %p2409_p8 = por %p2408_p7, %p2407_p6 }
  0x14   :  { %p2410_p9 = pnand %p2409_p8, %p2403_p5 }
  0x16   :  { %2413 = shalt.err (!%p2410_p9)
}
  0x17   :  { %30 = dma.hbm_to_vmem [thread:$0]  %s2930_s0, 1024, %s25_s16, [#allocation5], %s2506_s18, %s2506_s18, %s2507_s19  }
  0x18   :  { %s2508_s25 = smov [#allocation9]   ;;  %s2509_s27 = smov [#allocation10]  }
  0x19   :  { %s54_s26 = sshll.u32 %s2508_s25, 4  ;;  %s66_s28 = sshll.u32 %s2509_s27, 4  ;;  %s55_s26 = int_to_ptr.vmem [resolvable:$true] %s54_s26  ;;  %s67_s28 = int_to_ptr.vmem [resolvable:$true] %s66_s28 }
  0x1a   :  { %s2422_s2 = scalar_lea.vmem %s55_s26, 2048  ;;  %p2427_p11 = scmp.lt.s32.totalorder %s55_s26, %s55_s26 }
  0x1b   :  { %p2423_p10 = scmp.ne.s32.totalorder %s55_s26, %s2422_s2  ;;  %p2428_p12 = scmp.lt.s32.totalorder %s2422_s2, %s2422_s2 }
  0x1d   :  { %p2429_p13 = por %p2428_p12, %p2427_p11 }
  0x1f   :  { %p2430_p0 = pnand %p2429_p13, %p2423_p10 }
  0x21   :  { %2433 = shalt.err (!%p2430_p0)
}
  0x22   :  { %60 = dma.hbm_to_vmem [thread:$0]  %s2936_s6, 2048, %s55_s26, [#allocation8], %s2506_s18, %s2506_s18, %s2507_s19  }
  0x23   :  { %s2442_s0 = scalar_lea.vmem %s67_s28, 2048  ;;  %p2447_p2 = scmp.lt.s32.totalorder %s67_s28, %s67_s28 }
  0x24   :  { %p2443_p1 = scmp.ne.s32.totalorder %s67_s28, %s2442_s0  ;;  %p2448_p3 = scmp.lt.s32.totalorder %s2442_s0, %s2442_s0 }
  0x26   :  { %p2449_p4 = por %p2448_p3, %p2447_p2 }
  0x28   :  { %p2450_p5 = pnand %p2449_p4, %p2443_p1 }
  0x2a   :  { %2453 = shalt.err (!%p2450_p5)
}
  0x2b   :  { %72 = dma.hbm_to_vmem [thread:$0]  %s2937_s7, 2048, %s67_s28, [#allocation11], %s2506_s18, %s2506_s18, %s2507_s19  }
  0x2c   :  { %2494 = dma.done.wait [#allocation5], 1024  }
  0x2d   :  { %2495 = vsyncadd [#allocation5], 4294966272 }
  0x2e   :  { %2496 = dma.done.wait [#allocation8], 3072  }
  0x2f   :  { %2497 = vsyncadd [#allocation8], 4294964224 }
  0x30   :  { %2498 = dma.done.wait [#allocation11], 2048  }
  0x31   :  { %2499 = vsyncadd [#allocation11], 4294965248  ;;  %v2312_v0 = vld [vmem:[#allocation7 + $0x38] sm:$0xff]   ;;  %v2313_v1 = vld [vmem:[#allocation7 + $0x30] sm:$0xff]   ;;  %s2510_s6 = smov [#allocation2]  }
  0x32   :  { %2062 = vmatprep.subr.bf16.mxu0 %v2312_v0  ;;  %v2314_v2 = vld [vmem:[#allocation7 + $0x28] sm:$0xff]   ;;  %v2315_v3 = vld [vmem:[#allocation7 + $0x20] sm:$0xff]   ;;  %v2316_v5 = vld [vmem:[#allocation7 + $0x18] sm:$0xff]   ;;  %s97_s7 = sshll.u32 %s2510_s6, 4  ;;  %s98_s7 = int_to_ptr.vmem [resolvable:$true] %s97_s7 }
  0x33   :  { %2063 = vmatpush3.bf16.msra.mxu0 %v2312_v0  ;;  %v2320_v4 = vld [vmem:[#allocation4] sm:$0xff]   ;;  %v2317_v6 = vld [vmem:[#allocation7 + $0x10] sm:$0xff]   ;;  %v2318_v7 = vld [vmem:[#allocation7 + $0x8] sm:$0xff]   ;;  %s2462_s13 = scalar_lea.vmem %s98_s7, 1024  ;;  %p2467_p7 = scmp.lt.s32.totalorder %s98_s7, %s98_s7 }
  0x34   :  { %2064 = vmatprep.subr.bf16.mxu0 %v2313_v1  ;;  %2078 = vmatprep.mubr.bf16.mxu0 %v2320_v4  ;;  %v2319_v8 = vld [vmem:[#allocation7] sm:$0xff]   ;;  %v2321_v9 = vld [vmem:[#allocation4 + $0x8] sm:$0xff]   ;;  %v2322_v10 = vld [vmem:[#allocation4 + $0x10] sm:$0xff]   ;;  %p2463_p6 = scmp.ne.s32.totalorder %s98_s7, %s2462_s13  ;;  %p2468_p8 = scmp.lt.s32.totalorder %s2462_s13, %s2462_s13 }
  0x35   :  { %v2323_v11 = vld [vmem:[#allocation4 + $0x18] sm:$0xff]   ;;  %v2324_v12 = vld [vmem:[#allocation4 + $0x20] sm:$0xff]   ;;  %v2325_v13 = vld [vmem:[#allocation4 + $0x28] sm:$0xff]  }
  0x36   :  { %v2326_v14 = vld [vmem:[#allocation4 + $0x30] sm:$0xff]   ;;  %v2327_v15 = vld [vmem:[#allocation4 + $0x38] sm:$0xff]   ;;  %p2469_p9 = por %p2468_p8, %p2467_p7 }
  0x37   :  { %2065 = vmatpush3.bf16.msra.mxu0 %v2313_v1 }
  0x38   :  { %2066 = vmatprep.subr.bf16.mxu0 %v2314_v2  ;;  %p2470_p10 = pnand %p2469_p9, %p2463_p6 }
  0x3b   :  { %2067 = vmatpush3.bf16.msra.mxu0 %v2314_v2 }
  0x3c   :  { %2068 = vmatprep.subr.bf16.mxu0 %v2315_v3 }
  0x3f   :  { %2069 = vmatpush3.bf16.msra.mxu0 %v2315_v3 }
  0x40   :  { %2070 = vmatprep.subr.bf16.mxu0 %v2316_v5 }
  0x43   :  { %2071 = vmatpush3.bf16.msra.mxu0 %v2316_v5 }
  0x44   :  { %2072 = vmatprep.subr.bf16.mxu0 %v2317_v6 }
  0x47   :  { %2073 = vmatpush3.bf16.msra.mxu0 %v2317_v6 }
  0x48   :  { %2074 = vmatprep.subr.bf16.mxu0 %v2318_v7 }
  0x4b   :  { %2075 = vmatpush3.bf16.msra.mxu0 %v2318_v7 }
  0x4c   :  { %2076 = vmatprep.subr.bf16.mxu0 %v2319_v8 }
  0x4f   :  { %2077 = vmatpush3.bf16.msra.mxu0 %v2319_v8 }
  0x52   :  { %2079 = vmatmul.mubr.bf16.vlgmr.msra.gmra.mxu0 %v2321_v9 }
  0x53   :  { %2082 = vmatprep.mubr.bf16.mxu0 %v2322_v10 }
  0x5a   :  { %2083 = vmatmul.mubr.bf16.gmra.mxu0 %v2323_v11 }
  0x5b   :  { %2086 = vmatprep.mubr.bf16.mxu0 %v2324_v12 }
  0x62   :  { %2087 = vmatmul.mubr.bf16.gmra.mxu0 %v2325_v13 }
  0x63   :  { %2090 = vmatprep.mubr.bf16.mxu0 %v2326_v14 }
  0x6a   :  { %2091 = vmatmul.mubr.bf16.gmra.mxu0 %v2327_v15 }
  0x6b   :  { %2473 = shalt.err (!%p2470_p10)  }
  0x6c   :  { %100 = dma.hbm_to_vmem [thread:$0]  %s2931_s1, 1024, %s98_s7, [#allocation3]  ;;  %v2599_v17 = vld [vmem:[%s2933_s3] ss:$0 sm:$0xff] }
 0x112   :  { %v2080_v16 = vpop.f32.mrf.mxu0 }
 0x113   :  { %v2602_v19 = vadd.f32 %v2080_v16, %v2599_v17 }
 0x114   :  { %v335_v18 = vpop.f32.mrf.mxu0 }
 0x115   :  { %v2605_v21 = vadd.f32 %v2599_v17, %v335_v18  ;;  %v402_v24 = vmul.f32 0.0, %v2602_v19 }
 0x116   :  { %v2081_v20 = vpop.f32.mrf.mxu0 }
 0x117   :  { %v2608_v22 = vadd.f32 %v2081_v20, %v2599_v17  ;;  %v437_v28 = vmul.f32 %v2605_v21, %v2605_v21  ;;  %v439_v32 = vmul.f32 %v402_v24, %v402_v24 }
 0x118   :  { %v338_v23 = vpop.f32.mrf.mxu0 }
 0x119   :  { %v2612_v25 = vadd.f32 %v2599_v17, %v338_v23  ;;  %v403_v26 = vmul.f32 0.0, %v2608_v22 }
 0x11a   :  { %v2084_v27 = vpop.f32.mrf.mxu0 }
 0x11b   :  { %v416_v29 = vadd.f32 %v2612_v25, %v2605_v21  ;;  %v438_v30 = vmul.f32 %v2612_v25, %v2612_v25  ;;  %v440_v36 = vmul.f32 %v403_v26, %v403_v26  ;;  %v2625_v39 = vadd.f32 %v2084_v27, %v2599_v17 }
 0x11c   :  { %v351_v31 = vpop.f32.mrf.mxu0 }
 0x11d   :  { %v417_v33 = vadd.f32 %v416_v29, %v402_v24  ;;  %v453_v34 = vadd.f32 %v438_v30, %v437_v28  ;;  %v2622_v35 = vadd.f32 %v2599_v17, %v351_v31  ;;  %v406_v48 = vmul.f32 0.0, %v2625_v39 }
 0x11e   :  { %v2085_v37 = vpop.f32.mrf.mxu0 }
 0x11f   :  { %v454_v38 = vadd.f32 %v453_v34, %v439_v32  ;;  %v404_v40 = vmul.f32 0.0, %v2622_v35  ;;  %v418_v41 = vadd.f32 %v417_v33, %v403_v26  ;;  %v2629_v42 = vadd.f32 %v2085_v37, %v2599_v17 }
 0x120   :  { %v354_v43 = vpop.f32.mrf.mxu0  ;;  %v443_v59 = vmul.f32 %v406_v48, %v406_v48 }
 0x121   :  { %v441_v44 = vmul.f32 %v404_v40, %v404_v40  ;;  %v455_v45 = vadd.f32 %v454_v38, %v440_v36  ;;  %v2632_v46 = vadd.f32 %v2599_v17, %v354_v43  ;;  %v419_v49 = vadd.f32 %v418_v41, %v404_v40 }
 0x122   :  { %v2088_v47 = vpop.f32.mrf.mxu0  ;;  %v407_v51 = vmul.f32 0.0, %v2629_v42 }
 0x123   :  { %v405_v50 = vmul.f32 0.0, %v2632_v46  ;;  %v456_v53 = vadd.f32 %v455_v45, %v441_v44  ;;  %v2641_v57 = vadd.f32 %v2088_v47, %v2599_v17 }
 0x124   :  { %v367_v52 = vpop.f32.mrf.mxu0  ;;  %v444_v1 = vmul.f32 %v407_v51, %v407_v51 }
 0x125   :  { %v420_v54 = vadd.f32 %v419_v49, %v405_v50  ;;  %v442_v55 = vmul.f32 %v405_v50, %v405_v50  ;;  %v2638_v56 = vadd.f32 %v2599_v17, %v367_v52  ;;  %v410_v5 = vmul.f32 0.0, %v2641_v57 }
 0x126   :  { %v2089_v58 = vpop.f32.mrf.mxu0 }
 0x127   :  { %v421_v60 = vadd.f32 %v420_v54, %v406_v48  ;;  %v457_v61 = vadd.f32 %v456_v53, %v442_v55  ;;  %v408_v62 = vmul.f32 0.0, %v2638_v56  ;;  %v2645_v63 = vadd.f32 %v2089_v58, %v2599_v17 }
 0x128   :  { %v370_v0 = vpop.f32.mrf.mxu0  ;;  %v447_v23 = vmul.f32 %v410_v5, %v410_v5 }
 0x129   :  { %v458_v2 = vadd.f32 %v457_v61, %v443_v59  ;;  %v422_v3 = vadd.f32 %v421_v60, %v407_v51  ;;  %v2648_v4 = vadd.f32 %v2599_v17, %v370_v0  ;;  %v445_v8 = vmul.f32 %v408_v62, %v408_v62 }
 0x12a   :  { %v2092_v6 = vpop.f32.mrf.mxu0  ;;  %v411_v11 = vmul.f32 0.0, %v2645_v63 }
 0x12b   :  { %v423_v7 = vadd.f32 %v422_v3, %v408_v62  ;;  %v459_v9 = vadd.f32 %v458_v2, %v444_v1  ;;  %v409_v10 = vmul.f32 0.0, %v2648_v4  ;;  %v2654_v16 = vadd.f32 %v2092_v6, %v2599_v17 }
 0x12c   :  { %v383_v12 = vpop.f32.mrf.mxu0  ;;  %v448_v27 = vmul.f32 %v411_v11, %v411_v11 }
 0x12d   :  { %v460_v13 = vadd.f32 %v459_v9, %v445_v8  ;;  %v424_v14 = vadd.f32 %v423_v7, %v409_v10  ;;  %v446_v15 = vmul.f32 %v409_v10, %v409_v10  ;;  %v2657_v18 = vadd.f32 %v2599_v17, %v383_v12 }
 0x12e   :  { %v2093_v20 = vpop.f32.mrf.mxu0  ;;  %v414_v34 = vmul.f32 0.0, %v2654_v16 }
 0x12f   :  { %v425_v24 = vadd.f32 %v424_v14, %v410_v5  ;;  %v461_v26 = vadd.f32 %v460_v13, %v446_v15  ;;  %v412_v28 = vmul.f32 0.0, %v2657_v18  ;;  %v2661_v32 = vadd.f32 %v2093_v20, %v2599_v17  ;;  %v398_v13 = vld [vmem:[%s2934_s4] sm:$0x1] }
 0x130   :  { %v386_v29 = vpop.f32.mrf.mxu0  ;;  %v451_v47 = vmul.f32 %v414_v34, %v414_v34 }
 0x131   :  { %v462_v30 = vadd.f32 %v461_v26, %v447_v23  ;;  %v426_v31 = vadd.f32 %v425_v24, %v411_v11  ;;  %v2664_v33 = vadd.f32 %v2599_v17, %v386_v29  ;;  %v449_v37 = vmul.f32 %v412_v28, %v412_v28 }
 0x132   :  { %v415_v43 = vmul.f32 0.0, %v2661_v32  ;;  %v498_v11 = vlaneseq }
 0x133   :  { %v427_v36 = vadd.f32 %v426_v31, %v412_v28  ;;  %v463_v38 = vadd.f32 %v462_v30, %v448_v27  ;;  %v413_v40 = vmul.f32 0.0, %v2664_v33 }
 0x134   :  { %v452_v50 = vmul.f32 %v415_v43, %v415_v43  ;;  %v499_v12 = vshrl.u32 %v498_v11, 7 }
 0x135   :  { %v464_v41 = vadd.f32 %v463_v38, %v449_v37  ;;  %v428_v44 = vadd.f32 %v427_v36, %v413_v40  ;;  %v450_v45 = vmul.f32 %v413_v40, %v413_v40 }
 0x136   :  { %v2672_v14 = vsub.s32 0, %v499_v12 }
 0x137   :  { %v429_v48 = vadd.f32 %v428_v44, %v414_v34  ;;  %v465_v49 = vadd.f32 %v464_v41, %v450_v45 }
 0x139   :  { %v430_v51 = vadd.f32 %v429_v48, %v415_v43  ;;  %v466_v52 = vadd.f32 %v465_v49, %v451_v47 }
 0x13b   :  { %v431_v17 = vrot.slane %v430_v51, 4  ;;  %v467_v53 = vadd.f32 %v466_v52, %v452_v50 }
 0x13d   :  { %v432_v54 = vadd.f32 %v431_v17, %v430_v51  ;;  %v468_v55 = vrot.slane %v467_v53, 4 }
 0x13f   :  { %v433_v58 = vrot.slane %v432_v54, 2  ;;  %v469_v59 = vadd.f32 %v468_v55, %v467_v53 }
 0x141   :  { %v434_v60 = vadd.f32 %v433_v58, %v432_v54  ;;  %v470_v61 = vrot.slane %v469_v59, 2 }
 0x143   :  { %v435_v62 = vrot.slane %v434_v60, 1  ;;  %v471_v0 = vadd.f32 %v470_v61, %v469_v59 }
 0x145   :  { %v436_v1 = vadd.f32 %v435_v62, %v434_v60  ;;  %v472_v2 = vrot.slane %v471_v0, 1 }
 0x147   :  { %v473_v3 = vadd.f32 %v472_v2, %v471_v0  ;;  %v474_v5 = vmul.f32 0.0625, %v436_v1 }
 0x149   :  { %v475_v6 = vmul.f32 0.0625, %v473_v3  ;;  %v476_v7 = vmul.f32 %v474_v5, %v474_v5  ;;  %v479_v20 = vsub.f32 %v2605_v21, %v474_v5  ;;  %v480_v23 = vsub.f32 %v2612_v25, %v474_v5 }
 0x14a   :  { %v481_v24 = vsub.f32 %v2602_v19, %v474_v5  ;;  %v482_v26 = vsub.f32 %v2608_v22, %v474_v5  ;;  %v483_v27 = vsub.f32 %v2622_v35, %v474_v5  ;;  %v484_v29 = vsub.f32 %v2632_v46, %v474_v5 }
 0x14b   :  { %v477_v8 = vsub.f32 %v475_v6, %v476_v7  ;;  %v485_v30 = vsub.f32 %v2625_v39, %v474_v5  ;;  %v486_v31 = vsub.f32 %v2629_v42, %v474_v5  ;;  %v487_v34 = vsub.f32 %v2638_v56, %v474_v5 }
 0x14c   :  { %v488_v36 = vsub.f32 %v2648_v4, %v474_v5  ;;  %v489_v21 = vsub.f32 %v2641_v57, %v474_v5  ;;  %v490_v25 = vsub.f32 %v2645_v63, %v474_v5  ;;  %v491_v22 = vsub.f32 %v2657_v18, %v474_v5  ;;  %v1904_v57 = vld [vmem:[%s2935_s5] ss:$0 sm:$0xff] }
 0x14d   :  { %v478_v9 = vmax.f32 %v477_v8, 0.0  ;;  %v492_v35 = vsub.f32 %v2664_v33, %v474_v5  ;;  %v493_v46 = vsub.f32 %v2654_v16, %v474_v5  ;;  %v494_v39 = vsub.f32 %v2661_v32, %v474_v5 }
 0x14f   :  { %v495_v10 = vadd.f32 1e-05, %v478_v9 }
 0x151   :  { %2328 = vrsqrt.f32 %v495_v10 }
 0x15e   :  { %v2329_v15 = vpop.eup %2328 }
 0x15f   :  { %v497_v28 = vmul.f32 %v2329_v15, %v398_v13 }
 0x161   :  { %v501_v19 = vrot.slane %v497_v28, %v2672_v14 }
 0x163   :  { %v502_v37 = vmul.f32 %v501_v19, %v479_v20  ;;  %v503_v42 = vmul.f32 %v501_v19, %v480_v23  ;;  %v504_v38 = vmul.f32 %v501_v19, %v481_v24  ;;  %v505_v56 = vmul.f32 %v501_v19, %v482_v26 }
 0x164   :  { %v506_v4 = vmul.f32 %v501_v19, %v483_v27  ;;  %v507_v63 = vmul.f32 %v501_v19, %v484_v29  ;;  %v508_v40 = vmul.f32 %v501_v19, %v485_v30  ;;  %v509_v41 = vmul.f32 %v501_v19, %v486_v31 }
 0x165   :  { %v510_v43 = vmul.f32 %v501_v19, %v487_v34  ;;  %v511_v18 = vmul.f32 %v501_v19, %v488_v36  ;;  %v512_v44 = vmul.f32 %v501_v19, %v489_v21  ;;  %v513_v33 = vmul.f32 %v501_v19, %v490_v25 }
 0x166   :  { %v514_v45 = vmul.f32 %v501_v19, %v491_v22  ;;  %v515_v16 = vmul.f32 %v501_v19, %v492_v35  ;;  %v516_v47 = vmul.f32 %v501_v19, %v493_v46  ;;  %v517_v32 = vmul.f32 %v501_v19, %v494_v39 }
 0x167   :  { %v524_v48 = vadd.f32 %v1904_v57, %v502_v37  ;;  %v525_v49 = vadd.f32 %v1904_v57, %v503_v42  ;;  %v526_v50 = vadd.f32 %v1904_v57, %v504_v38  ;;  %v527_v51 = vadd.f32 %v1904_v57, %v505_v56 }
 0x168   :  { %v528_v52 = vadd.f32 %v1904_v57, %v506_v4  ;;  %v529_v17 = vadd.f32 %v1904_v57, %v507_v63  ;;  %v530_v53 = vadd.f32 %v1904_v57, %v508_v40  ;;  %v531_v54 = vadd.f32 %v1904_v57, %v509_v41 }
 0x169   :  { %v532_v55 = vadd.f32 %v1904_v57, %v510_v43  ;;  %v533_v58 = vadd.f32 %v1904_v57, %v511_v18  ;;  %v534_v59 = vadd.f32 %v1904_v57, %v512_v44  ;;  %v535_v60 = vadd.f32 %v1904_v57, %v513_v33 }
 0x16a   :  { %v536_v61 = vadd.f32 %v1904_v57, %v514_v45  ;;  %v537_v62 = vadd.f32 %v1904_v57, %v515_v16  ;;  %v538_v0 = vadd.f32 %v1904_v57, %v516_v47  ;;  %v539_v1 = vadd.f32 %v1904_v57, %v517_v32 }
 0x16c   :  { %v567_v2 = vpack.c.bf16 %v539_v1, %v538_v0  ;;  %v566_v3 = vpack.c.bf16 %v537_v62, %v536_v61 }
 0x16d   :  { %2500 = dma.done.wait [#allocation3], 1024 }
 0x16e   :  { %2501 = vsyncadd [#allocation3], 4294966272  ;;  %2094 = vmatprep.subr.bf16.mxu1 %v567_v2  ;;  %v565_v5 = vpack.c.bf16 %v535_v60, %v534_v59  ;;  %v2694_v6 = vld [vmem:[#allocation2] sm:$0xff]   ;;  %v564_v7 = vpack.c.bf16 %v533_v58, %v532_v55  ;;  %v563_v8 = vpack.c.bf16 %v531_v54, %v530_v53  ;;  %v2338_v9 = vld [vmem:[#allocation9 + $0x38] sm:$0xff]   ;;  %v562_v10 = vpack.c.bf16 %v529_v17, %v528_v52 }
 0x16f   :  { %2095 = vmatpush3.bf16.msra.mxu1 %v567_v2  ;;  %2110 = vmatprep.mubr.bf16.mxu1 %v2694_v6  ;;  %v2339_v11 = vld [vmem:[#allocation9 + $0x30] sm:$0xff]   ;;  %v2340_v12 = vld [vmem:[#allocation9 + $0x28] sm:$0xff]   ;;  %v561_v13 = vpack.c.bf16 %v527_v51, %v526_v50  ;;  %v2341_v15 = vld [vmem:[#allocation9 + $0x20] sm:$0xff]   ;;  %v560_v20 = vpack.c.bf16 %v525_v49, %v524_v48 }
 0x170   :  { %2096 = vmatprep.subr.bf16.mxu1 %v566_v3  ;;  %2126 = vmatprep.subr.bf16.mxu0 %v2338_v9  ;;  %v2342_v23 = vld [vmem:[#allocation9 + $0x18] sm:$0xff]   ;;  %v2697_v24 = vld [vmem:[#allocation2 + $0x8] sm:$0xff]   ;;  %v2699_v26 = vld [vmem:[#allocation2 + $0x10] sm:$0xff]  }
 0x171   :  { %2127 = vmatpush3.bf16.msra.mxu0 %v2338_v9  ;;  %v2343_v27 = vld [vmem:[#allocation9 + $0x10] sm:$0xff]   ;;  %v2703_v28 = vld [vmem:[#allocation2 + $0x18] sm:$0xff]   ;;  %v2705_v29 = vld [vmem:[#allocation2 + $0x20] sm:$0xff]  }
 0x172   :  { %2128 = vmatprep.subr.bf16.mxu0 %v2339_v11  ;;  %v2709_v30 = vld [vmem:[#allocation2 + $0x28] sm:$0xff]   ;;  %v2711_v31 = vld [vmem:[#allocation2 + $0x30] sm:$0xff]   ;;  %v2715_v34 = vld [vmem:[#allocation2 + $0x38] sm:$0xff]  }
 0x173   :  { %2097 = vmatpush3.bf16.msra.mxu1 %v566_v3  ;;  %v2344_v36 = vld [vmem:[#allocation9 + $0x8] sm:$0xff]   ;;  %v2345_v21 = vld [vmem:[#allocation9] sm:$0xff]   ;;  %v2346_v25 = vld [vmem:[#allocation10 + $0x38] sm:$0xff]  }
 0x174   :  { %2098 = vmatprep.subr.bf16.mxu1 %v565_v5  ;;  %v2347_v19 = vld [vmem:[#allocation10 + $0x30] sm:$0xff]   ;;  %v2348_v22 = vld [vmem:[#allocation10 + $0x28] sm:$0xff]   ;;  %v2349_v35 = vld [vmem:[#allocation10 + $0x20] sm:$0xff]  }
 0x175   :  { %2129 = vmatpush3.bf16.msra.mxu0 %v2339_v11  ;;  %v2350_v46 = vld [vmem:[#allocation10 + $0x18] sm:$0xff]   ;;  %v2351_v53 = vld [vmem:[#allocation10 + $0x10] sm:$0xff]   ;;  %v2352_v54 = vld [vmem:[#allocation10 + $0x8] sm:$0xff]  }
 0x176   :  { %2130 = vmatprep.subr.bf16.mxu0 %v2340_v12  ;;  %v2353_v55 = vld [vmem:[#allocation10] sm:$0xff]  }
 0x177   :  { %2099 = vmatpush3.bf16.msra.mxu1 %v565_v5 }
 0x178   :  { %2100 = vmatprep.subr.bf16.mxu1 %v564_v7 }
 0x179   :  { %2131 = vmatpush3.bf16.msra.mxu0 %v2340_v12 }
 0x17a   :  { %2132 = vmatprep.subr.bf16.mxu0 %v2341_v15 }
 0x17b   :  { %2101 = vmatpush3.bf16.msra.mxu1 %v564_v7 }
 0x17c   :  { %2102 = vmatprep.subr.bf16.mxu1 %v563_v8 }
 0x17d   :  { %2133 = vmatpush3.bf16.msra.mxu0 %v2341_v15 }
 0x17e   :  { %2134 = vmatprep.subr.bf16.mxu0 %v2342_v23 }
 0x17f   :  { %2103 = vmatpush3.bf16.msra.mxu1 %v563_v8 }
 0x180   :  { %2104 = vmatprep.subr.bf16.mxu1 %v562_v10 }
 0x181   :  { %2135 = vmatpush3.bf16.msra.mxu0 %v2342_v23 }
 0x182   :  { %2136 = vmatprep.subr.bf16.mxu0 %v2343_v27 }
 0x183   :  { %2105 = vmatpush3.bf16.msra.mxu1 %v562_v10 }
 0x184   :  { %2106 = vmatprep.subr.bf16.mxu1 %v561_v13 }
 0x185   :  { %2137 = vmatpush3.bf16.msra.mxu0 %v2343_v27 }
 0x186   :  { %2138 = vmatprep.subr.bf16.mxu0 %v2344_v36 }
 0x187   :  { %2107 = vmatpush3.bf16.msra.mxu1 %v561_v13 }
 0x188   :  { %2108 = vmatprep.subr.bf16.mxu1 %v560_v20 }
 0x189   :  { %2139 = vmatpush3.bf16.msra.mxu0 %v2344_v36 }
 0x18a   :  { %2140 = vmatprep.subr.bf16.mxu0 %v2345_v21 }
 0x18b   :  { %2109 = vmatpush3.bf16.msra.mxu1 %v560_v20 }
 0x18c   :  { %2158 = vmatprep.subr.bf16.mxu1 %v2346_v25 }
 0x18d   :  { %2141 = vmatpush3.bf16.msra.mxu0 %v2345_v21 }
 0x18e   :  { %2111 = vmatmul.mubr.bf16.vlgmr.msra.gmra.mxu1 %v2697_v24 }
 0x18f   :  { %2114 = vmatprep.mubr.bf16.mxu1 %v2699_v26  ;;  %2159 = vmatpush3.bf16.msra.mxu1 %v2346_v25 }
 0x190   :  { %2160 = vmatprep.subr.bf16.mxu1 %v2347_v19 }
 0x193   :  { %2161 = vmatpush3.bf16.msra.mxu1 %v2347_v19 }
 0x194   :  { %2162 = vmatprep.subr.bf16.mxu1 %v2348_v22 }
 0x196   :  { %2115 = vmatmul.mubr.bf16.gmra.mxu1 %v2703_v28 }
 0x197   :  { %2118 = vmatprep.mubr.bf16.mxu1 %v2705_v29  ;;  %2163 = vmatpush3.bf16.msra.mxu1 %v2348_v22 }
 0x198   :  { %2164 = vmatprep.subr.bf16.mxu1 %v2349_v35 }
 0x19b   :  { %2165 = vmatpush3.bf16.msra.mxu1 %v2349_v35 }
 0x19c   :  { %2166 = vmatprep.subr.bf16.mxu1 %v2350_v46 }
 0x19e   :  { %2119 = vmatmul.mubr.bf16.gmra.mxu1 %v2709_v30 }
 0x19f   :  { %2122 = vmatprep.mubr.bf16.mxu1 %v2711_v31  ;;  %2167 = vmatpush3.bf16.msra.mxu1 %v2350_v46 }
 0x1a0   :  { %2168 = vmatprep.subr.bf16.mxu1 %v2351_v53 }
 0x1a3   :  { %2169 = vmatpush3.bf16.msra.mxu1 %v2351_v53 }
 0x1a4   :  { %2170 = vmatprep.subr.bf16.mxu1 %v2352_v54 }
 0x1a6   :  { %2123 = vmatmul.mubr.bf16.gmra.mxu1 %v2715_v34 }
 0x1a7   :  { %2171 = vmatpush3.bf16.msra.mxu1 %v2352_v54 }
 0x1a8   :  { %2172 = vmatprep.subr.bf16.mxu1 %v2353_v55 }
 0x1ab   :  { %2173 = vmatpush3.bf16.msra.mxu1 %v2353_v55 }
 0x24e   :  { %v2112_v39 = vpop.f32.mrf.mxu1 }
 0x250   :  { %v650_v37 = vpop.f32.mrf.mxu1 }
 0x252   :  { %v2113_v42 = vpop.f32.mrf.mxu1 }
 0x253   :  { %v714_v57 = vpack.c.bf16 %v2113_v42, %v2112_v39 }
 0x254   :  { %v653_v38 = vpop.f32.mrf.mxu1 }
 0x255   :  { %v713_v56 = vpack.c.bf16 %v653_v38, %v650_v37 }
 0x256   :  { %v2116_v4 = vpop.f32.mrf.mxu1 }
 0x257   :  { %2142 = vmatprep.mubr.bf16.mxu0 %v713_v56 }
 0x258   :  { %v666_v63 = vpop.f32.mrf.mxu1  ;;  %2143 = vmatmul.mubr.bf16.vlgmr.msra.gmra.mxu0 %v714_v57 }
 0x25a   :  { %v2117_v40 = vpop.f32.mrf.mxu1 }
 0x25b   :  { %v716_v18 = vpack.c.bf16 %v2117_v40, %v2116_v4 }
 0x25c   :  { %v669_v41 = vpop.f32.mrf.mxu1 }
 0x25d   :  { %v715_v43 = vpack.c.bf16 %v669_v41, %v666_v63 }
 0x25e   :  { %v2120_v44 = vpop.f32.mrf.mxu1 }
 0x25f   :  { %2146 = vmatprep.mubr.bf16.mxu0 %v715_v43 }
 0x260   :  { %v682_v33 = vpop.f32.mrf.mxu1  ;;  %2147 = vmatmul.mubr.bf16.gmra.mxu0 %v716_v18 }
 0x262   :  { %v2121_v45 = vpop.f32.mrf.mxu1 }
 0x263   :  { %v718_v32 = vpack.c.bf16 %v2121_v45, %v2120_v44 }
 0x264   :  { %v685_v16 = vpop.f32.mrf.mxu1 }
 0x265   :  { %v717_v47 = vpack.c.bf16 %v685_v16, %v682_v33 }
 0x266   :  { %v2124_v48 = vpop.f32.mrf.mxu1 }
 0x267   :  { %2150 = vmatprep.mubr.bf16.mxu0 %v717_v47 }
 0x268   :  { %v698_v49 = vpop.f32.mrf.mxu1  ;;  %2151 = vmatmul.mubr.bf16.gmra.mxu0 %v718_v32 }
 0x26a   :  { %v2125_v50 = vpop.f32.mrf.mxu1 }
 0x26b   :  { %v720_v17 = vpack.c.bf16 %v2125_v50, %v2124_v48 }
 0x26c   :  { %v701_v51 = vpop.f32.mrf.mxu1 }
 0x26d   :  { %v719_v52 = vpack.c.bf16 %v701_v51, %v698_v49 }
 0x26f   :  { %2154 = vmatprep.mubr.bf16.mxu0 %v719_v52 }
 0x270   :  { %2155 = vmatmul.mubr.bf16.gmra.mxu0 %v720_v17 }
 0x271   :  { %2206 = vmatprep.mubr.bf16.mxu0 %v2694_v6 }
 0x318   :  { %v2144_v58 = vpop.f32.mrf.mxu0 }
 0x319   :  { %v884_v2 = vmax.f32 %v2144_v58, 0.0 }
 0x31a   :  { %v819_v59 = vpop.f32.mrf.mxu0 }
 0x31b   :  { %v882_v0 = vmax.f32 %v819_v59, 0.0 }
 0x31c   :  { %v2145_v60 = vpop.f32.mrf.mxu0 }
 0x31d   :  { %v885_v61 = vmax.f32 %v2145_v60, 0.0 }
 0x31e   :  { %v822_v62 = vpop.f32.mrf.mxu0 }
 0x31f   :  { %v883_v1 = vmax.f32 %v822_v62, 0.0  ;;  %v899_v6 = vpack.c.bf16 %v885_v61, %v884_v2 }
 0x320   :  { %v2148_v3 = vpop.f32.mrf.mxu0 }
 0x321   :  { %v898_v5 = vpack.c.bf16 %v883_v1, %v882_v0  ;;  %v888_v13 = vmax.f32 %v2148_v3, 0.0 }
 0x322   :  { %v835_v7 = vpop.f32.mrf.mxu0 }
 0x323   :  { %2174 = vmatprep.mubr.bf16.mxu1 %v898_v5  ;;  %v886_v11 = vmax.f32 %v835_v7, 0.0 }
 0x324   :  { %v2149_v8 = vpop.f32.mrf.mxu0  ;;  %2175 = vmatmul.mubr.bf16.vlgmr.msra.gmra.mxu1 %v899_v6 }
 0x325   :  { %v889_v9 = vmax.f32 %v2149_v8, 0.0 }
 0x326   :  { %v838_v10 = vpop.f32.mrf.mxu0 }
 0x327   :  { %v887_v12 = vmax.f32 %v838_v10, 0.0  ;;  %v901_v23 = vpack.c.bf16 %v889_v9, %v888_v13  ;;  %v2354_v10 = vld [vmem:[#allocation9 + $0x78] sm:$0xff]  }
 0x328   :  { %v2152_v15 = vpop.f32.mrf.mxu0  ;;  %2222 = vmatprep.subr.bf16.mxu1 %v2354_v10 }
 0x329   :  { %v900_v20 = vpack.c.bf16 %v887_v12, %v886_v11  ;;  %v892_v35 = vmax.f32 %v2152_v15, 0.0  ;;  %v2355_v11 = vld [vmem:[#allocation9 + $0x70] sm:$0xff]   ;;  %2223 = vmatpush3.bf16.msra.mxu1 %v2354_v10 }
 0x32a   :  { %v851_v27 = vpop.f32.mrf.mxu0  ;;  %2224 = vmatprep.subr.bf16.mxu1 %v2355_v11 }
 0x32b   :  { %2178 = vmatprep.mubr.bf16.mxu1 %v900_v20  ;;  %v890_v19 = vmax.f32 %v851_v27, 0.0 }
 0x32c   :  { %v2153_v36 = vpop.f32.mrf.mxu0  ;;  %2179 = vmatmul.mubr.bf16.gmra.mxu1 %v901_v23 }
 0x32d   :  { %v893_v21 = vmax.f32 %v2153_v36, 0.0  ;;  %2225 = vmatpush3.bf16.msra.mxu1 %v2355_v11 }
 0x32e   :  { %v854_v25 = vpop.f32.mrf.mxu0 }
 0x32f   :  { %v891_v22 = vmax.f32 %v854_v25, 0.0  ;;  %v903_v37 = vpack.c.bf16 %v893_v21, %v892_v35 }
 0x330   :  { %v2156_v46 = vpop.f32.mrf.mxu0 }
 0x331   :  { %v902_v39 = vpack.c.bf16 %v891_v22, %v890_v19  ;;  %v896_v40 = vmax.f32 %v2156_v46, 0.0  ;;  %v2356_v22 = vld [vmem:[#allocation9 + $0x68] sm:$0xff]  }
 0x332   :  { %v867_v42 = vpop.f32.mrf.mxu0  ;;  %2226 = vmatprep.subr.bf16.mxu1 %v2356_v22 }
 0x333   :  { %2182 = vmatprep.mubr.bf16.mxu1 %v902_v39  ;;  %v894_v4 = vmax.f32 %v867_v42, 0.0  ;;  %2227 = vmatpush3.bf16.msra.mxu1 %v2356_v22  ;;  %v2359_v22 = vld [vmem:[#allocation9 + $0x50] sm:$0xff]  }
 0x334   :  { %v2157_v38 = vpop.f32.mrf.mxu0  ;;  %2183 = vmatmul.mubr.bf16.gmra.mxu1 %v903_v37 }
 0x335   :  { %v897_v56 = vmax.f32 %v2157_v38, 0.0 }
 0x336   :  { %v870_v57 = vpop.f32.mrf.mxu0 }
 0x337   :  { %v895_v63 = vmax.f32 %v870_v57, 0.0  ;;  %v905_v43 = vpack.c.bf16 %v897_v56, %v896_v40 }
 0x339   :  { %v904_v41 = vpack.c.bf16 %v895_v63, %v894_v4 }
 0x33b   :  { %2186 = vmatprep.mubr.bf16.mxu1 %v904_v41 }
 0x33c   :  { %2187 = vmatmul.mubr.bf16.gmra.mxu1 %v905_v43  ;;  %v2357_v43 = vld [vmem:[#allocation9 + $0x60] sm:$0xff]  }
 0x33d   :  { %2228 = vmatprep.subr.bf16.mxu1 %v2357_v43 }
 0x33e   :  { %2229 = vmatpush3.bf16.msra.mxu1 %v2357_v43 }
 0x3e4   :  { %v2719_v18 = vpop.f32.mrf.mxu1 }
 0x3e5   :  { %v1069_v33 = vmax.f32 %v2719_v18, 0.0 }
 0x3e6   :  { %v1004_v44 = vpop.f32.mrf.mxu1 }
 0x3e7   :  { %v2724_v16 = vmax.f32 %v1004_v44, 0.0  ;;  %v1087_v48 = vmul.f32 0.0, %v1069_v33 }
 0x3e8   :  { %v2722_v45 = vpop.f32.mrf.mxu1 }
 0x3e9   :  { %v1070_v47 = vmax.f32 %v2722_v45, 0.0  ;;  %v1122_v52 = vmul.f32 %v2724_v16, %v2724_v16  ;;  %v1124_v55 = vmul.f32 %v1087_v48, %v1087_v48 }
 0x3ea   :  { %v1007_v32 = vpop.f32.mrf.mxu1 }
 0x3eb   :  { %v2729_v49 = vmax.f32 %v1007_v32, 0.0  ;;  %v1088_v50 = vmul.f32 0.0, %v1070_v47 }
 0x3ec   :  { %v2733_v51 = vpop.f32.mrf.mxu1 }
 0x3ed   :  { %v1101_v17 = vadd.f32 %v2729_v49, %v2724_v16  ;;  %v1123_v53 = vmul.f32 %v2729_v49, %v2729_v49  ;;  %v1125_v61 = vmul.f32 %v1088_v50, %v1088_v50  ;;  %v1073_v1 = vmax.f32 %v2733_v51, 0.0 }
 0x3ee   :  { %v2741_v54 = vpop.f32.mrf.mxu1 }
 0x3ef   :  { %v1102_v58 = vadd.f32 %v1101_v17, %v1087_v48  ;;  %v1138_v59 = vadd.f32 %v1123_v53, %v1122_v52  ;;  %v1071_v60 = vmax.f32 %v2741_v54, 0.0  ;;  %v1091_v13 = vmul.f32 0.0, %v1073_v1 }
 0x3f0   :  { %v2744_v62 = vpop.f32.mrf.mxu1 }
 0x3f1   :  { %v1139_v0 = vadd.f32 %v1138_v59, %v1124_v55  ;;  %v1089_v2 = vmul.f32 0.0, %v1071_v60  ;;  %v1103_v3 = vadd.f32 %v1102_v58, %v1088_v50  ;;  %v1074_v5 = vmax.f32 %v2744_v62, 0.0 }
 0x3f2   :  { %v2750_v6 = vpop.f32.mrf.mxu1  ;;  %v1128_v39 = vmul.f32 %v1091_v13, %v1091_v13 }
 0x3f3   :  { %v1126_v7 = vmul.f32 %v1089_v2, %v1089_v2  ;;  %v1140_v8 = vadd.f32 %v1139_v0, %v1125_v61  ;;  %v1072_v9 = vmax.f32 %v2750_v6, 0.0  ;;  %v1104_v15 = vadd.f32 %v1103_v3, %v1089_v2  ;;  %v2358_v0 = vld [vmem:[#allocation9 + $0x58] sm:$0xff]  }
 0x3f4   :  { %v2753_v12 = vpop.f32.mrf.mxu1  ;;  %v1092_v23 = vmul.f32 0.0, %v1074_v5  ;;  %2230 = vmatprep.subr.bf16.mxu1 %v2358_v0 }
 0x3f5   :  { %v1090_v20 = vmul.f32 0.0, %v1072_v9  ;;  %v1141_v36 = vadd.f32 %v1140_v8, %v1126_v7  ;;  %v1077_v35 = vmax.f32 %v2753_v12, 0.0  ;;  %2231 = vmatpush3.bf16.msra.mxu1 %v2358_v0 }
 0x3f6   :  { %v2761_v27 = vpop.f32.mrf.mxu1  ;;  %v1129_v4 = vmul.f32 %v1092_v23, %v1092_v23  ;;  %2232 = vmatprep.subr.bf16.mxu1 %v2359_v22 }
 0x3f7   :  { %v1105_v21 = vadd.f32 %v1104_v15, %v1090_v20  ;;  %v1127_v25 = vmul.f32 %v1090_v20, %v1090_v20  ;;  %v1075_v19 = vmax.f32 %v2761_v27, 0.0  ;;  %v1095_v44 = vmul.f32 0.0, %v1077_v35 }
 0x3f8   :  { %v2765_v46 = vpop.f32.mrf.mxu1 }
 0x3f9   :  { %v1106_v37 = vadd.f32 %v1105_v21, %v1091_v13  ;;  %v1142_v42 = vadd.f32 %v1141_v36, %v1127_v25  ;;  %v1093_v38 = vmul.f32 0.0, %v1075_v19  ;;  %v1078_v56 = vmax.f32 %v2765_v46, 0.0  ;;  %2233 = vmatpush3.bf16.msra.mxu1 %v2359_v22 }
 0x3fa   :  { %v2770_v57 = vpop.f32.mrf.mxu1  ;;  %v1132_v8 = vmul.f32 %v1095_v44, %v1095_v44 }
 0x3fb   :  { %v1143_v63 = vadd.f32 %v1142_v42, %v1128_v39  ;;  %v1107_v40 = vadd.f32 %v1106_v37, %v1092_v23  ;;  %v1076_v41 = vmax.f32 %v2770_v57, 0.0  ;;  %v1130_v50 = vmul.f32 %v1093_v38, %v1093_v38 }
 0x3fc   :  { %v2775_v32 = vpop.f32.mrf.mxu1  ;;  %v1096_v53 = vmul.f32 0.0, %v1078_v56 }
 0x3fd   :  { %v1108_v48 = vadd.f32 %v1107_v40, %v1093_v38  ;;  %v1144_v52 = vadd.f32 %v1143_v63, %v1129_v4  ;;  %v1094_v17 = vmul.f32 0.0, %v1076_v41  ;;  %v1081_v2 = vmax.f32 %v2775_v32, 0.0 }
 0x3fe   :  { %v2781_v55 = vpop.f32.mrf.mxu1  ;;  %v1133_v13 = vmul.f32 %v1096_v53, %v1096_v53 }
 0x3ff   :  { %v1145_v58 = vadd.f32 %v1144_v52, %v1130_v50  ;;  %v1109_v59 = vadd.f32 %v1108_v48, %v1094_v17  ;;  %v1131_v61 = vmul.f32 %v1094_v17, %v1094_v17  ;;  %v1079_v3 = vmax.f32 %v2781_v55, 0.0 }
 0x400   :  { %v2189_v7 = vpop.f32.mrf.mxu1  ;;  %v1099_v39 = vmul.f32 0.0, %v1081_v2 }
 0x401   :  { %v1110_v10 = vadd.f32 %v1109_v59, %v1095_v44  ;;  %v1146_v11 = vadd.f32 %v1145_v58, %v1131_v61  ;;  %v1097_v15 = vmul.f32 0.0, %v1079_v3  ;;  %v1082_v21 = vmax.f32 %v2189_v7, 0.0 }
 0x402   :  { %v1055_v20 = vpop.f32.mrf.mxu1  ;;  %v1136_v48 = vmul.f32 %v1099_v39, %v1099_v39 }
 0x403   :  { %v1147_v23 = vadd.f32 %v1146_v11, %v1132_v8  ;;  %v1111_v36 = vadd.f32 %v1110_v10, %v1096_v53  ;;  %v1080_v25 = vmax.f32 %v1055_v20, 0.0  ;;  %v1134_v42 = vmul.f32 %v1097_v15, %v1097_v15 }
 0x404   :  { %v1100_v40 = vmul.f32 0.0, %v1082_v21 }
 0x405   :  { %v1112_v37 = vadd.f32 %v1111_v36, %v1097_v15  ;;  %v1148_v38 = vadd.f32 %v1147_v23, %v1133_v13  ;;  %v1098_v4 = vmul.f32 0.0, %v1080_v25 }
 0x406   :  { %v1137_v52 = vmul.f32 %v1100_v40, %v1100_v40 }
 0x407   :  { %v1149_v63 = vadd.f32 %v1148_v38, %v1134_v42  ;;  %v1113_v44 = vadd.f32 %v1112_v37, %v1098_v4  ;;  %v1135_v32 = vmul.f32 %v1098_v4, %v1098_v4  ;;  %v1083_v4 = vld [vmem:[%s2938_s8] sm:$0x1] }
 0x409   :  { %v1114_v50 = vadd.f32 %v1113_v44, %v1099_v39  ;;  %v1150_v43 = vadd.f32 %v1149_v63, %v1135_v32 }
 0x40b   :  { %v1115_v17 = vadd.f32 %v1114_v50, %v1100_v40  ;;  %v1151_v53 = vadd.f32 %v1150_v43, %v1136_v48 }
 0x40d   :  { %v1116_v55 = vrot.slane %v1115_v17, 4  ;;  %v1152_v58 = vadd.f32 %v1151_v53, %v1137_v52 }
 0x40f   :  { %v1117_v59 = vadd.f32 %v1116_v55, %v1115_v17  ;;  %v1153_v61 = vrot.slane %v1152_v58, 4 }
 0x411   :  { %v1118_v7 = vrot.slane %v1117_v59, 2  ;;  %v1154_v8 = vadd.f32 %v1153_v61, %v1152_v58 }
 0x413   :  { %v1119_v10 = vadd.f32 %v1118_v7, %v1117_v59  ;;  %v1155_v0 = vrot.slane %v1154_v8, 2 }
 0x415   :  { %v1120_v11 = vrot.slane %v1119_v10, 1  ;;  %v1156_v13 = vadd.f32 %v1155_v0, %v1154_v8 }
 0x417   :  { %v1121_v15 = vadd.f32 %v1120_v11, %v1119_v10  ;;  %v1157_v20 = vrot.slane %v1156_v13, 1 }
 0x419   :  { %v1158_v23 = vadd.f32 %v1157_v20, %v1156_v13  ;;  %v1159_v36 = vmul.f32 0.0625, %v1121_v15 }
 0x41b   :  { %v1160_v39 = vmul.f32 0.0625, %v1158_v23  ;;  %v1161_v37 = vmul.f32 %v1159_v36, %v1159_v36  ;;  %v1177_v40 = vsub.f32 %v1080_v25, %v1159_v36  ;;  %v1178_v32 = vsub.f32 %v1081_v2, %v1159_v36 }
 0x41c   :  { %v1179_v48 = vsub.f32 %v1082_v21, %v1159_v36  ;;  %v1176_v50 = vsub.f32 %v1079_v3, %v1159_v36  ;;  %v1174_v43 = vsub.f32 %v1077_v35, %v1159_v36  ;;  %v1175_v52 = vsub.f32 %v1078_v56, %v1159_v36  ;;  %v1929_v35 = vld [vmem:[%s2939_s9] ss:$0 sm:$0xff] }
 0x41d   :  { %v1162_v22 = vsub.f32 %v1160_v39, %v1161_v37  ;;  %v1172_v17 = vsub.f32 %v1075_v19, %v1159_v36  ;;  %v1173_v53 = vsub.f32 %v1076_v41, %v1159_v36  ;;  %v1170_v25 = vsub.f32 %v1073_v1, %v1159_v36 }
 0x41e   :  { %v1171_v2 = vsub.f32 %v1074_v5, %v1159_v36  ;;  %v1168_v12 = vsub.f32 %v1071_v60, %v1159_v36  ;;  %v1169_v27 = vsub.f32 %v1072_v9, %v1159_v36  ;;  %v1166_v19 = vsub.f32 %v1069_v33, %v1159_v36 }
 0x41f   :  { %v1163_v42 = vmax.f32 %v1162_v22, 0.0  ;;  %v1167_v51 = vsub.f32 %v1070_v47, %v1159_v36  ;;  %v1164_v1 = vsub.f32 %v2724_v16, %v1159_v36  ;;  %v1165_v45 = vsub.f32 %v2729_v49, %v1159_v36 }
 0x421   :  { %v1180_v38 = vadd.f32 1e-05, %v1163_v42 }
 0x423   :  { %2370 = vrsqrt.f32 %v1180_v38 }
 0x430   :  { %v2371_v63 = vpop.eup %2370 }
 0x431   :  { %v1182_v44 = vmul.f32 %v2371_v63, %v1083_v4 }
 0x433   :  { %v1186_v55 = vrot.slane %v1182_v44, %v2672_v14 }
 0x435   :  { %v1200_v62 = vmul.f32 %v1186_v55, %v1177_v40  ;;  %v1201_v5 = vmul.f32 %v1186_v55, %v1178_v32  ;;  %v1202_v46 = vmul.f32 %v1186_v55, %v1179_v48  ;;  %v1199_v54 = vmul.f32 %v1186_v55, %v1176_v50  ;;  %v2360_v48 = vld [vmem:[#allocation9 + $0x48] sm:$0xff]   ;;  %v2361_v50 = vld [vmem:[#allocation9 + $0x40] sm:$0xff]  }
 0x436   :  { %v1197_v60 = vmul.f32 %v1186_v55, %v1174_v43  ;;  %v1198_v56 = vmul.f32 %v1186_v55, %v1175_v52  ;;  %v1195_v57 = vmul.f32 %v1186_v55, %v1172_v17  ;;  %v1196_v41 = vmul.f32 %v1186_v55, %v1173_v53  ;;  %2234 = vmatprep.subr.bf16.mxu1 %v2360_v48  ;;  %v2362_v43 = vld [vmem:[#allocation10 + $0x78] sm:$0xff]  }
 0x437   :  { %v1223_v3 = vadd.f32 %v1929_v35, %v1201_v5  ;;  %v1224_v21 = vadd.f32 %v1929_v35, %v1202_v46  ;;  %v1221_v6 = vadd.f32 %v1929_v35, %v1199_v54  ;;  %v1222_v9 = vadd.f32 %v1929_v35, %v1200_v62  ;;  %2235 = vmatpush3.bf16.msra.mxu1 %v2360_v48 }
 0x438   :  { %v1219_v58 = vadd.f32 %v1929_v35, %v1197_v60  ;;  %v1217_v18 = vadd.f32 %v1929_v35, %v1195_v57  ;;  %v1218_v33 = vadd.f32 %v1929_v35, %v1196_v41  ;;  %v1220_v59 = vadd.f32 %v1929_v35, %v1198_v56  ;;  %2236 = vmatprep.subr.bf16.mxu1 %v2361_v50 }
 0x439   :  { %v1232_v47 = vpack.c.bf16 %v1224_v21, %v1223_v3  ;;  %v1193_v16 = vmul.f32 %v1186_v55, %v1170_v25  ;;  %v1194_v61 = vmul.f32 %v1186_v55, %v1171_v2  ;;  %v1231_v7 = vpack.c.bf16 %v1222_v9, %v1221_v6  ;;  %v2367_v21 = vld [vmem:[#allocation10 + $0x50] sm:$0xff]   ;;  %v2368_v6 = vld [vmem:[#allocation10 + $0x48] sm:$0xff]   ;;  %v2369_v9 = vld [vmem:[#allocation10 + $0x40] sm:$0xff]  }
 0x43a   :  { %v1229_v8 = vpack.c.bf16 %v1218_v33, %v1217_v18  ;;  %v1191_v10 = vmul.f32 %v1186_v55, %v1168_v12  ;;  %v1192_v0 = vmul.f32 %v1186_v55, %v1169_v27  ;;  %v1189_v15 = vmul.f32 %v1186_v55, %v1166_v19 }
 0x43b   :  { %2190 = vmatprep.subr.bf16.mxu0 %v1232_v47  ;;  %v1215_v11 = vadd.f32 %v1929_v35, %v1193_v16  ;;  %v1216_v13 = vadd.f32 %v1929_v35, %v1194_v61  ;;  %v1190_v20 = vmul.f32 %v1186_v55, %v1167_v51  ;;  %v1187_v37 = vmul.f32 %v1186_v55, %v1164_v1 }
 0x43c   :  { %2191 = vmatpush3.bf16.msra.mxu0 %v1232_v47  ;;  %v1213_v23 = vadd.f32 %v1929_v35, %v1191_v10  ;;  %v1214_v39 = vadd.f32 %v1929_v35, %v1192_v0  ;;  %v1188_v22 = vmul.f32 %v1186_v55, %v1165_v45  ;;  %v1211_v36 = vadd.f32 %v1929_v35, %v1189_v15 }
 0x43d   :  { %2192 = vmatprep.subr.bf16.mxu0 %v1231_v7  ;;  %v1228_v49 = vpack.c.bf16 %v1216_v13, %v1215_v11  ;;  %v1212_v42 = vadd.f32 %v1929_v35, %v1190_v20  ;;  %v1209_v4 = vadd.f32 %v1929_v35, %v1187_v37  ;;  %v1230_v40 = vpack.c.bf16 %v1220_v59, %v1219_v58 }
 0x43e   :  { %v1227_v38 = vpack.c.bf16 %v1214_v39, %v1213_v23  ;;  %v1210_v63 = vadd.f32 %v1929_v35, %v1188_v22  ;;  %2237 = vmatpush3.bf16.msra.mxu1 %v2361_v50 }
 0x43f   :  { %v1226_v44 = vpack.c.bf16 %v1212_v42, %v1211_v36  ;;  %2286 = vmatprep.subr.bf16.mxu1 %v2362_v43 }
 0x440   :  { %2193 = vmatpush3.bf16.msra.mxu0 %v1231_v7  ;;  %v1225_v32 = vpack.c.bf16 %v1210_v63, %v1209_v4 }
 0x441   :  { %2194 = vmatprep.subr.bf16.mxu0 %v1230_v40 }
 0x444   :  { %2195 = vmatpush3.bf16.msra.mxu0 %v1230_v40 }
 0x445   :  { %2196 = vmatprep.subr.bf16.mxu0 %v1229_v8 }
 0x448   :  { %2197 = vmatpush3.bf16.msra.mxu0 %v1229_v8 }
 0x449   :  { %2198 = vmatprep.subr.bf16.mxu0 %v1228_v49 }
 0x44c   :  { %2199 = vmatpush3.bf16.msra.mxu0 %v1228_v49 }
 0x44d   :  { %2200 = vmatprep.subr.bf16.mxu0 %v1227_v38 }
 0x450   :  { %2201 = vmatpush3.bf16.msra.mxu0 %v1227_v38 }
 0x451   :  { %2202 = vmatprep.subr.bf16.mxu0 %v1226_v44 }
 0x454   :  { %2203 = vmatpush3.bf16.msra.mxu0 %v1226_v44 }
 0x455   :  { %2204 = vmatprep.subr.bf16.mxu0 %v1225_v32 }
 0x458   :  { %2205 = vmatpush3.bf16.msra.mxu0 %v1225_v32 }
 0x459   :  { %2254 = vmatprep.subr.bf16.mxu0 %v2362_v43 }
 0x45b   :  { %2207 = vmatmul.mubr.bf16.vlgmr.msra.gmra.mxu0 %v2697_v24  ;;  %v2363_v24 = vld [vmem:[#allocation10 + $0x70] sm:$0xff]  }
 0x45c   :  { %2210 = vmatprep.mubr.bf16.mxu0 %v2699_v26  ;;  %2255 = vmatpush3.bf16.msra.mxu0 %v2362_v43  ;;  %v2364_v26 = vld [vmem:[#allocation10 + $0x68] sm:$0xff]  }
 0x45d   :  { %2256 = vmatprep.subr.bf16.mxu0 %v2363_v24 }
 0x460   :  { %2257 = vmatpush3.bf16.msra.mxu0 %v2363_v24 }
 0x461   :  { %2258 = vmatprep.subr.bf16.mxu0 %v2364_v26 }
 0x463   :  { %2211 = vmatmul.mubr.bf16.gmra.mxu0 %v2703_v28  ;;  %v2365_v28 = vld [vmem:[#allocation10 + $0x60] sm:$0xff]  }
 0x464   :  { %2214 = vmatprep.mubr.bf16.mxu0 %v2705_v29  ;;  %2259 = vmatpush3.bf16.msra.mxu0 %v2364_v26  ;;  %v2366_v29 = vld [vmem:[#allocation10 + $0x58] sm:$0xff]  }
 0x465   :  { %2260 = vmatprep.subr.bf16.mxu0 %v2365_v28 }
 0x468   :  { %2261 = vmatpush3.bf16.msra.mxu0 %v2365_v28 }
 0x469   :  { %2262 = vmatprep.subr.bf16.mxu0 %v2366_v29 }
 0x46b   :  { %2215 = vmatmul.mubr.bf16.gmra.mxu0 %v2709_v30 }
 0x46c   :  { %2218 = vmatprep.mubr.bf16.mxu0 %v2711_v31  ;;  %2263 = vmatpush3.bf16.msra.mxu0 %v2366_v29 }
 0x46d   :  { %2264 = vmatprep.subr.bf16.mxu0 %v2367_v21 }
 0x470   :  { %2265 = vmatpush3.bf16.msra.mxu0 %v2367_v21 }
 0x471   :  { %2266 = vmatprep.subr.bf16.mxu0 %v2368_v6 }
 0x473   :  { %2219 = vmatmul.mubr.bf16.gmra.mxu0 %v2715_v34 }
 0x474   :  { %2267 = vmatpush3.bf16.msra.mxu0 %v2368_v6 }
 0x475   :  { %2268 = vmatprep.subr.bf16.mxu0 %v2369_v9 }
 0x478   :  { %2269 = vmatpush3.bf16.msra.mxu0 %v2369_v9 }
 0x51b   :  { %v2208_v30 = vpop.f32.mrf.mxu0 }
 0x51d   :  { %v1267_v31 = vpop.f32.mrf.mxu0 }
 0x51f   :  { %v2209_v34 = vpop.f32.mrf.mxu0 }
 0x520   :  { %v1331_v53 = vpack.c.bf16 %v2209_v34, %v2208_v30 }
 0x521   :  { %v1270_v52 = vpop.f32.mrf.mxu0 }
 0x522   :  { %v1330_v17 = vpack.c.bf16 %v1270_v52, %v1267_v31 }
 0x523   :  { %v2212_v55 = vpop.f32.mrf.mxu0 }
 0x524   :  { %2238 = vmatprep.mubr.bf16.mxu1 %v1330_v17 }
 0x525   :  { %v1283_v25 = vpop.f32.mrf.mxu0  ;;  %2239 = vmatmul.mubr.bf16.vlgmr.msra.gmra.mxu1 %v1331_v53 }
 0x526   :  { %2294 = vmatpush3.bf16.msra.mxu1 %v2362_v43 }
 0x527   :  { %v2213_v2 = vpop.f32.mrf.mxu0  ;;  %2287 = vmatprep.subr.bf16.mxu1 %v2363_v24 }
 0x528   :  { %v1333_v27 = vpack.c.bf16 %v2213_v2, %v2212_v55 }
 0x529   :  { %v1286_v12 = vpop.f32.mrf.mxu0 }
 0x52a   :  { %v1332_v35 = vpack.c.bf16 %v1286_v12, %v1283_v25  ;;  %2295 = vmatpush3.bf16.msra.mxu1 %v2363_v24 }
 0x52b   :  { %v2216_v19 = vpop.f32.mrf.mxu0  ;;  %2288 = vmatprep.subr.bf16.mxu1 %v2364_v26 }
 0x52c   :  { %2242 = vmatprep.mubr.bf16.mxu1 %v1332_v35 }
 0x52d   :  { %v1299_v51 = vpop.f32.mrf.mxu0  ;;  %2243 = vmatmul.mubr.bf16.gmra.mxu1 %v1333_v27 }
 0x52e   :  { %2296 = vmatpush3.bf16.msra.mxu1 %v2364_v26 }
 0x52f   :  { %v2217_v1 = vpop.f32.mrf.mxu0  ;;  %2289 = vmatprep.subr.bf16.mxu1 %v2365_v28 }
 0x530   :  { %v1335_v46 = vpack.c.bf16 %v2217_v1, %v2216_v19 }
 0x531   :  { %v1302_v62 = vpop.f32.mrf.mxu0 }
 0x532   :  { %v1334_v5 = vpack.c.bf16 %v1302_v62, %v1299_v51  ;;  %2297 = vmatpush3.bf16.msra.mxu1 %v2365_v28 }
 0x533   :  { %v2220_v54 = vpop.f32.mrf.mxu0  ;;  %2290 = vmatprep.subr.bf16.mxu1 %v2366_v29 }
 0x534   :  { %2246 = vmatprep.mubr.bf16.mxu1 %v1334_v5 }
 0x535   :  { %v1315_v60 = vpop.f32.mrf.mxu0  ;;  %2247 = vmatmul.mubr.bf16.gmra.mxu1 %v1335_v46 }
 0x536   :  { %2298 = vmatpush3.bf16.msra.mxu1 %v2366_v29 }
 0x537   :  { %v2221_v56 = vpop.f32.mrf.mxu0  ;;  %2291 = vmatprep.subr.bf16.mxu1 %v2367_v21 }
 0x538   :  { %v1337_v3 = vpack.c.bf16 %v2221_v56, %v2220_v54 }
 0x539   :  { %v1318_v57 = vpop.f32.mrf.mxu0 }
 0x53a   :  { %v1336_v41 = vpack.c.bf16 %v1318_v57, %v1315_v60  ;;  %2299 = vmatpush3.bf16.msra.mxu1 %v2367_v21 }
 0x53b   :  { %2292 = vmatprep.subr.bf16.mxu1 %v2368_v6 }
 0x53c   :  { %2250 = vmatprep.mubr.bf16.mxu1 %v1336_v41 }
 0x53d   :  { %2251 = vmatmul.mubr.bf16.gmra.mxu1 %v1337_v3 }
 0x53e   :  { %2300 = vmatpush3.bf16.msra.mxu1 %v2368_v6 }
 0x53f   :  { %2293 = vmatprep.subr.bf16.mxu1 %v2369_v9 }
 0x542   :  { %2301 = vmatpush3.bf16.msra.mxu1 %v2369_v9 }
 0x5e5   :  { %v2240_v58 = vpop.f32.mrf.mxu1 }
 0x5e6   :  { %v1502_v61 = vmax.f32 %v2240_v58, 0.0 }
 0x5e7   :  { %v1437_v18 = vpop.f32.mrf.mxu1 }
 0x5e8   :  { %v1500_v59 = vmax.f32 %v1437_v18, 0.0 }
 0x5e9   :  { %v2241_v33 = vpop.f32.mrf.mxu1 }
 0x5ea   :  { %v1503_v45 = vmax.f32 %v2241_v33, 0.0 }
 0x5eb   :  { %v1440_v47 = vpop.f32.mrf.mxu1 }
 0x5ec   :  { %v1501_v16 = vmax.f32 %v1440_v47, 0.0  ;;  %v1517_v10 = vpack.c.bf16 %v1503_v45, %v1502_v61 }
 0x5ed   :  { %v2244_v7 = vpop.f32.mrf.mxu1 }
 0x5ee   :  { %v1516_v8 = vpack.c.bf16 %v1501_v16, %v1500_v59  ;;  %v1506_v39 = vmax.f32 %v2244_v7, 0.0 }
 0x5ef   :  { %v1453_v0 = vpop.f32.mrf.mxu1 }
 0x5f0   :  { %2270 = vmatprep.mubr.bf16.mxu0 %v1516_v8  ;;  %v1504_v20 = vmax.f32 %v1453_v0, 0.0 }
 0x5f1   :  { %v2245_v11 = vpop.f32.mrf.mxu1  ;;  %2271 = vmatmul.mubr.bf16.vlgmr.msra.gmra.mxu0 %v1517_v10 }
 0x5f2   :  { %v1507_v13 = vmax.f32 %v2245_v11, 0.0 }
 0x5f3   :  { %v1456_v15 = vpop.f32.mrf.mxu1 }
 0x5f4   :  { %v1505_v23 = vmax.f32 %v1456_v15, 0.0  ;;  %v1519_v49 = vpack.c.bf16 %v1507_v13, %v1506_v39 }
 0x5f5   :  { %v2248_v37 = vpop.f32.mrf.mxu1 }
 0x5f6   :  { %v1518_v22 = vpack.c.bf16 %v1505_v23, %v1504_v20  ;;  %v1510_v44 = vmax.f32 %v2248_v37, 0.0 }
 0x5f7   :  { %v1469_v36 = vpop.f32.mrf.mxu1 }
 0x5f8   :  { %2274 = vmatprep.mubr.bf16.mxu0 %v1518_v22  ;;  %v1508_v63 = vmax.f32 %v1469_v36, 0.0 }
 0x5f9   :  { %v2249_v42 = vpop.f32.mrf.mxu1  ;;  %2275 = vmatmul.mubr.bf16.gmra.mxu0 %v1519_v49 }
 0x5fa   :  { %v1511_v38 = vmax.f32 %v2249_v42, 0.0 }
 0x5fb   :  { %v1472_v4 = vpop.f32.mrf.mxu1 }
 0x5fc   :  { %v1509_v40 = vmax.f32 %v1472_v4, 0.0  ;;  %v1521_v50 = vpack.c.bf16 %v1511_v38, %v1510_v44 }
 0x5fd   :  { %v2252_v32 = vpop.f32.mrf.mxu1 }
 0x5fe   :  { %v1520_v48 = vpack.c.bf16 %v1509_v40, %v1508_v63  ;;  %v1514_v31 = vmax.f32 %v2252_v32, 0.0 }
 0x5ff   :  { %v1485_v43 = vpop.f32.mrf.mxu1 }
 0x600   :  { %2278 = vmatprep.mubr.bf16.mxu1 %v1520_v48  ;;  %v1512_v29 = vmax.f32 %v1485_v43, 0.0 }
 0x601   :  { %v2253_v24 = vpop.f32.mrf.mxu1  ;;  %2279 = vmatmul.mubr.bf16.vlgmr.msra.gmra.mxu1 %v1521_v50 }
 0x602   :  { %v1515_v26 = vmax.f32 %v2253_v24, 0.0 }
 0x603   :  { %v1488_v28 = vpop.f32.mrf.mxu1 }
 0x604   :  { %v1513_v30 = vmax.f32 %v1488_v28, 0.0  ;;  %v1523_v52 = vpack.c.bf16 %v1515_v26, %v1514_v31 }
 0x606   :  { %v1522_v34 = vpack.c.bf16 %v1513_v30, %v1512_v29 }
 0x608   :  { %2282 = vmatprep.mubr.bf16.mxu1 %v1522_v34 }
 0x609   :  { %2283 = vmatmul.mubr.bf16.gmra.mxu1 %v1523_v52 }
 0x6b1   :  { %v2821_v17 = vpop.f32.mrf.mxu0 }
 0x6b2   :  { %v1688_v55 = vmax.f32 %v2821_v17, 0.0 }
 0x6b3   :  { %v1623_v53 = vpop.f32.mrf.mxu0 }
 0x6b4   :  { %v2826_v2 = vmax.f32 %v1623_v53, 0.0  ;;  %v1708_v27 = vmul.f32 0.0, %v1688_v55 }
 0x6b5   :  { %v2824_v25 = vpop.f32.mrf.mxu0 }
 0x6b6   :  { %v1689_v12 = vmax.f32 %v2824_v25, 0.0  ;;  %v1743_v62 = vmul.f32 %v2826_v2, %v2826_v2  ;;  %v1745_v60 = vmul.f32 %v1708_v27, %v1708_v27 }
 0x6b7   :  { %v1626_v35 = vpop.f32.mrf.mxu0 }
 0x6b8   :  { %v2831_v19 = vmax.f32 %v1626_v35, 0.0  ;;  %v1709_v51 = vmul.f32 0.0, %v1689_v12 }
 0x6b9   :  { %v2835_v1 = vpop.f32.mrf.mxu0 }
 0x6ba   :  { %v1722_v5 = vadd.f32 %v2831_v19, %v2826_v2  ;;  %v1744_v46 = vmul.f32 %v2831_v19, %v2831_v19  ;;  %v1746_v3 = vmul.f32 %v1709_v51, %v1709_v51  ;;  %v1692_v9 = vmax.f32 %v2835_v1, 0.0 }
 0x6bb   :  { %v2843_v54 = vpop.f32.mrf.mxu0 }
 0x6bc   :  { %v1723_v56 = vadd.f32 %v1722_v5, %v1708_v27  ;;  %v1759_v57 = vadd.f32 %v1744_v46, %v1743_v62  ;;  %v1690_v41 = vmax.f32 %v2843_v54, 0.0  ;;  %v1712_v7 = vmul.f32 0.0, %v1692_v9 }
 0x6bd   :  { %v2846_v21 = vpop.f32.mrf.mxu0 }
 0x6be   :  { %v1760_v6 = vadd.f32 %v1759_v57, %v1745_v60  ;;  %v1710_v58 = vmul.f32 0.0, %v1690_v41  ;;  %v1724_v18 = vadd.f32 %v1723_v56, %v1709_v51  ;;  %v1693_v33 = vmax.f32 %v2846_v21, 0.0 }
 0x6bf   :  { %v2852_v45 = vpop.f32.mrf.mxu0  ;;  %v1749_v22 = vmul.f32 %v1712_v7, %v1712_v7 }
 0x6c0   :  { %v1747_v47 = vmul.f32 %v1710_v58, %v1710_v58  ;;  %v1761_v59 = vadd.f32 %v1760_v6, %v1746_v3  ;;  %v1691_v16 = vmax.f32 %v2852_v45, 0.0  ;;  %v1725_v8 = vadd.f32 %v1724_v18, %v1710_v58 }
 0x6c1   :  { %v2855_v61 = vpop.f32.mrf.mxu1  ;;  %v1713_v0 = vmul.f32 0.0, %v1693_v33 }
 0x6c2   :  { %v1711_v10 = vmul.f32 0.0, %v1691_v16  ;;  %v1762_v13 = vadd.f32 %v1761_v59, %v1747_v47  ;;  %v1696_v39 = vmax.f32 %v2855_v61, 0.0 }
 0x6c3   :  { %v2863_v11 = vpop.f32.mrf.mxu1  ;;  %v1750_v63 = vmul.f32 %v1713_v0, %v1713_v0 }
 0x6c4   :  { %v1726_v15 = vadd.f32 %v1725_v8, %v1711_v10  ;;  %v1748_v20 = vmul.f32 %v1711_v10, %v1711_v10  ;;  %v1694_v23 = vmax.f32 %v2863_v11, 0.0  ;;  %v1716_v48 = vmul.f32 0.0, %v1696_v39 }
 0x6c5   :  { %v2867_v37 = vpop.f32.mrf.mxu1 }
 0x6c6   :  { %v1727_v49 = vadd.f32 %v1726_v15, %v1712_v7  ;;  %v1763_v36 = vadd.f32 %v1762_v13, %v1748_v20  ;;  %v1714_v42 = vmul.f32 0.0, %v1694_v23  ;;  %v1697_v38 = vmax.f32 %v2867_v37, 0.0 }
 0x6c7   :  { %v2872_v4 = vpop.f32.mrf.mxu1  ;;  %v1753_v51 = vmul.f32 %v1716_v48, %v1716_v48 }
 0x6c8   :  { %v1764_v40 = vadd.f32 %v1763_v36, %v1749_v22  ;;  %v1728_v44 = vadd.f32 %v1727_v49, %v1713_v0  ;;  %v1695_v32 = vmax.f32 %v2872_v4, 0.0  ;;  %v1751_v24 = vmul.f32 %v1714_v42, %v1714_v42 }
 0x6c9   :  { %v2877_v50 = vpop.f32.mrf.mxu1  ;;  %v1717_v29 = vmul.f32 0.0, %v1697_v38 }
 0x6ca   :  { %v1729_v43 = vadd.f32 %v1728_v44, %v1714_v42  ;;  %v1765_v26 = vadd.f32 %v1764_v40, %v1750_v63  ;;  %v1715_v28 = vmul.f32 0.0, %v1695_v32  ;;  %v1700_v53 = vmax.f32 %v2877_v50, 0.0 }
 0x6cb   :  { %v2883_v30 = vpop.f32.mrf.mxu1  ;;  %v1754_v46 = vmul.f32 %v1717_v29, %v1717_v29 }
 0x6cc   :  { %v1766_v31 = vadd.f32 %v1765_v26, %v1751_v24  ;;  %v1730_v34 = vadd.f32 %v1729_v43, %v1715_v28  ;;  %v1752_v52 = vmul.f32 %v1715_v28, %v1715_v28  ;;  %v1698_v35 = vmax.f32 %v2883_v30, 0.0 }
 0x6cd   :  { %v2887_v27 = vpop.f32.mrf.mxu1  ;;  %v1720_v18 = vmul.f32 0.0, %v1700_v53 }
 0x6ce   :  { %v1731_v62 = vadd.f32 %v1730_v34, %v1716_v48  ;;  %v1767_v5 = vadd.f32 %v1766_v31, %v1752_v52  ;;  %v1718_v60 = vmul.f32 0.0, %v1698_v35  ;;  %v1701_v6 = vmax.f32 %v2887_v27, 0.0 }
 0x6cf   :  { %v1674_v56 = vpop.f32.mrf.mxu1  ;;  %v1757_v20 = vmul.f32 %v1720_v18, %v1720_v18 }
 0x6d0   :  { %v1768_v57 = vadd.f32 %v1767_v5, %v1753_v51  ;;  %v1732_v3 = vadd.f32 %v1731_v62, %v1717_v29  ;;  %v1699_v58 = vmax.f32 %v1674_v56, 0.0  ;;  %v1755_v59 = vmul.f32 %v1718_v60, %v1718_v60 }
 0x6d1   :  { %v1721_v0 = vmul.f32 0.0, %v1701_v6 }
 0x6d2   :  { %v1733_v47 = vadd.f32 %v1732_v3, %v1718_v60  ;;  %v1769_v7 = vadd.f32 %v1768_v57, %v1754_v46  ;;  %v1719_v8 = vmul.f32 0.0, %v1699_v58  ;;  %v1946_v3 = vld [vmem:[%s2938_s8 + $0x1] sm:$0x1] }
 0x6d3   :  { %v1758_v36 = vmul.f32 %v1721_v0, %v1721_v0 }
 0x6d4   :  { %v1770_v10 = vadd.f32 %v1769_v7, %v1755_v59  ;;  %v1734_v13 = vadd.f32 %v1733_v47, %v1719_v8  ;;  %v1756_v15 = vmul.f32 %v1719_v8, %v1719_v8 }
 0x6d6   :  { %v1735_v22 = vadd.f32 %v1734_v13, %v1720_v18  ;;  %v1771_v49 = vadd.f32 %v1770_v10, %v1756_v15 }
 0x6d8   :  { %v1736_v42 = vadd.f32 %v1735_v22, %v1721_v0  ;;  %v1772_v63 = vadd.f32 %v1771_v49, %v1757_v20 }
 0x6da   :  { %v1737_v40 = vrot.slane %v1736_v42, 4  ;;  %v1773_v44 = vadd.f32 %v1772_v63, %v1758_v36 }
 0x6dc   :  { %v1738_v48 = vadd.f32 %v1737_v40, %v1736_v42  ;;  %v1774_v43 = vrot.slane %v1773_v44, 4 }
 0x6de   :  { %v1739_v24 = vrot.slane %v1738_v48, 2  ;;  %v1775_v26 = vadd.f32 %v1774_v43, %v1773_v44 }
 0x6e0   :  { %v1740_v28 = vadd.f32 %v1739_v24, %v1738_v48  ;;  %v1776_v29 = vrot.slane %v1775_v26, 2 }
 0x6e2   :  { %v1741_v31 = vrot.slane %v1740_v28, 1  ;;  %v1777_v34 = vadd.f32 %v1776_v29, %v1775_v26 }
 0x6e4   :  { %v1742_v52 = vadd.f32 %v1741_v31, %v1740_v28  ;;  %v1778_v27 = vrot.slane %v1777_v34, 1 }
 0x6e6   :  { %v1779_v51 = vadd.f32 %v1778_v27, %v1777_v34  ;;  %v1780_v62 = vmul.f32 0.0625, %v1742_v52 }
 0x6e8   :  { %v1781_v5 = vmul.f32 0.0625, %v1779_v51  ;;  %v1782_v46 = vmul.f32 %v1780_v62, %v1780_v62  ;;  %v1798_v47 = vsub.f32 %v1699_v58, %v1780_v62  ;;  %v1785_v59 = vsub.f32 %v2826_v2, %v1780_v62 }
 0x6e9   :  { %v1786_v8 = vsub.f32 %v2831_v19, %v1780_v62  ;;  %v1787_v10 = vsub.f32 %v1688_v55, %v1780_v62  ;;  %v1788_v0 = vsub.f32 %v1689_v12, %v1780_v62  ;;  %v1789_v13 = vsub.f32 %v1690_v41, %v1780_v62  ;;  %v1948_v12 = vld [vmem:[%s2939_s9 + $0x1] ss:$0 sm:$0xff]  ;;  %s2511_s9 = smov [#allocation12]  }
 0x6ea   :  { %v1783_v60 = vsub.f32 %v1781_v5, %v1782_v46  ;;  %v1790_v15 = vsub.f32 %v1691_v16, %v1780_v62  ;;  %v1791_v58 = vsub.f32 %v1692_v9, %v1780_v62  ;;  %v1792_v2 = vsub.f32 %v1693_v33, %v1780_v62  ;;  %s1867_s25 = sshll.u32 %s2511_s9, 4  ;;  %s1868_s25 = int_to_ptr.vmem [resolvable:$true] %s1867_s25 }
 0x6eb   :  { %v1793_v17 = vsub.f32 %v1694_v23, %v1780_v62  ;;  %v1794_v55 = vsub.f32 %v1695_v32, %v1780_v62  ;;  %v1795_v25 = vsub.f32 %v1696_v39, %v1780_v62  ;;  %v1796_v1 = vsub.f32 %v1697_v38, %v1780_v62  ;;  %s2474_s26 = scalar_lea.vmem %s1868_s25, 2048  ;;  %p2479_p12 = scmp.lt.s32.totalorder %s1868_s25, %s1868_s25 }
 0x6ec   :  { %v1784_v56 = vmax.f32 %v1783_v60, 0.0  ;;  %v1797_v54 = vsub.f32 %v1698_v35, %v1780_v62  ;;  %v1800_v41 = vsub.f32 %v1701_v6, %v1780_v62  ;;  %p2475_p11 = scmp.ne.s32.totalorder %s1868_s25, %s2474_s26  ;;  %p2480_p13 = scmp.lt.s32.totalorder %s2474_s26, %s2474_s26 }
 0x6ee   :  { %v1801_v57 = vadd.f32 1e-05, %v1784_v56  ;;  %p2481_p0 = por %p2480_p13, %p2479_p12 }
 0x6f0   :  { %2372 = vrsqrt.f32 %v1801_v57  ;;  %p2482_p1 = pnand %p2481_p0, %p2475_p11 }
 0x6fd   :  { %v2373_v18 = vpop.eup %2372 }
 0x6fe   :  { %v1803_v7 = vmul.f32 %v2373_v18, %v1946_v3 }
 0x700   :  { %v1807_v19 = vrot.slane %v1803_v7, %v2672_v14  ;;  %v1799_v14 = vsub.f32 %v1700_v53, %v1780_v62 }
 0x702   :  { %v1821_v21 = vmul.f32 %v1807_v19, %v1798_v47  ;;  %v1808_v9 = vmul.f32 %v1807_v19, %v1785_v59  ;;  %v1809_v33 = vmul.f32 %v1807_v19, %v1786_v8  ;;  %v1810_v45 = vmul.f32 %v1807_v19, %v1787_v10 }
 0x703   :  { %v1811_v16 = vmul.f32 %v1807_v19, %v1788_v0  ;;  %v1812_v61 = vmul.f32 %v1807_v19, %v1789_v13  ;;  %v1813_v11 = vmul.f32 %v1807_v19, %v1790_v15  ;;  %v1814_v23 = vmul.f32 %v1807_v19, %v1791_v58 }
 0x704   :  { %v1843_v39 = vadd.f32 %v1948_v12, %v1821_v21  ;;  %v1815_v4 = vmul.f32 %v1807_v19, %v1792_v2  ;;  %v1816_v32 = vmul.f32 %v1807_v19, %v1793_v17  ;;  %v1817_v37 = vmul.f32 %v1807_v19, %v1794_v55 }
 0x705   :  { %v1818_v38 = vmul.f32 %v1807_v19, %v1795_v25  ;;  %v1819_v20 = vmul.f32 %v1807_v19, %v1796_v1  ;;  %v1820_v30 = vmul.f32 %v1807_v19, %v1797_v54  ;;  %v1822_v35 = vmul.f32 %v1807_v19, %v1799_v14 }
 0x706   :  { %1859 = vst [vmem:[#allocation12 + $0x68] sm:$0xff] %v1843_v39  ;;  %v1823_v50 = vmul.f32 %v1807_v19, %v1800_v41  ;;  %v1830_v53 = vadd.f32 %v1948_v12, %v1808_v9  ;;  %v1831_v6 = vadd.f32 %v1948_v12, %v1809_v33  ;;  %v1832_v22 = vadd.f32 %v1948_v12, %v1810_v45 }
 0x707   :  { %v1833_v49 = vadd.f32 %v1948_v12, %v1811_v16  ;;  %v1834_v36 = vadd.f32 %v1948_v12, %v1812_v61  ;;  %v1835_v42 = vadd.f32 %v1948_v12, %v1813_v11  ;;  %v1836_v63 = vadd.f32 %v1948_v12, %v1814_v23 }
 0x708   :  { %v1837_v40 = vadd.f32 %v1948_v12, %v1815_v4  ;;  %v1838_v44 = vadd.f32 %v1948_v12, %v1816_v32  ;;  %v1839_v48 = vadd.f32 %v1948_v12, %v1817_v37  ;;  %v1840_v43 = vadd.f32 %v1948_v12, %v1818_v38  ;;  %1846 = vst [vmem:[#allocation12] sm:$0xff] %v1830_v53 }
 0x709   :  { %1847 = vst [vmem:[#allocation12 + $0x8] sm:$0xff] %v1831_v6  ;;  %1848 = vst [vmem:[#allocation12 + $0x10] sm:$0xff] %v1832_v22  ;;  %v1841_v24 = vadd.f32 %v1948_v12, %v1819_v20  ;;  %v1842_v26 = vadd.f32 %v1948_v12, %v1820_v30  ;;  %v1844_v28 = vadd.f32 %v1948_v12, %v1822_v35 }
 0x70a   :  { %v1845_v29 = vadd.f32 %v1948_v12, %v1823_v50  ;;  %1849 = vst [vmem:[#allocation12 + $0x18] sm:$0xff] %v1833_v49  ;;  %1850 = vst [vmem:[#allocation12 + $0x20] sm:$0xff] %v1834_v36 }
 0x70b   :  { %1851 = vst [vmem:[#allocation12 + $0x28] sm:$0xff] %v1835_v42  ;;  %1852 = vst [vmem:[#allocation12 + $0x30] sm:$0xff] %v1836_v63 }
 0x70c   :  { %1853 = vst [vmem:[#allocation12 + $0x38] sm:$0xff] %v1837_v40  ;;  %1854 = vst [vmem:[#allocation12 + $0x40] sm:$0xff] %v1838_v44 }
 0x70d   :  { %1855 = vst [vmem:[#allocation12 + $0x48] sm:$0xff] %v1839_v48  ;;  %1856 = vst [vmem:[#allocation12 + $0x50] sm:$0xff] %v1840_v43 }
 0x70e   :  { %1857 = vst [vmem:[#allocation12 + $0x58] sm:$0xff] %v1841_v24  ;;  %1858 = vst [vmem:[#allocation12 + $0x60] sm:$0xff] %v1842_v26 }
 0x70f   :  { %1860 = vst [vmem:[#allocation12 + $0x70] sm:$0xff] %v1844_v28  ;;  %1861 = vst [vmem:[#allocation12 + $0x78] sm:$0xff] %v1845_v29 }
 0x710   :  { %2485 = shalt.err (!%p2482_p1)
}
 0x711   :  { %s2512_s27 = smov 128   ;;  %s2513_s28 = smov 8  }
 0x712   :  { %1873 = dma.vmem_to_hbm [thread:$0]  %s1868_s25, 2048, %s2940_s10, [#allocation6], %s2512_s27, %s2512_s27, %s2513_s28  }
 0x713   :  { %2502 = dma.done.wait [#allocation6], 2048  }
 0x714   :  { %2503 = vsyncadd [#allocation6], 4294965248 }
 0x715   :  { %1877 = vsyncpa [#allocation5], 1 }
 0x716   :  { %1878 = vsyncpa [#allocation8], 1 }
 0x717   :  { %1879 = vsyncpa [#allocation11], 1 }
 0x718   :  { %1880 = vsyncpa [#allocation6], 1 }
 0x719   :  { %1881 = vsyncmov [#allocation3] }
 0x71c   :  { %s1882_s30 = vpop.sfrf %1881 }
 0x71d   :  { %p1949_p2 = scmp.ne.s32.totalorder %s1882_s30, 0 }
 0x71f   :  { %1886 = shalt.err (%p1949_p2)  }

</bundles_post_ra>
